<compile_context>
chip_gen: v7x
topology: tpu7x:2x2x1
jax: 0.10.0
libtpu: 0.0.40
codegen_flags: <defaults>
</compile_context>

<pallas_src>
import functools

import jax
import jax.numpy as jnp
import numpy as np
from jax import lax
from jax.experimental import pallas as pl
from jax.experimental.pallas import tpu as pltpu


# --------------------------------------------------------------------------
# Fused kernel: (stack + sent) BiLSTMs in one recurrence + dense heads + softmax.
#
# Layouts (all f32, whole-array VMEM blocks; everything is tiny at these shapes):
#   xc    : (T_max*Bp, 4E)  row t*Bp+b = [x0[t,b] | x0[T0-1-t,b] | x1[t,b] | x1[T1-1-t,b]]
#                           (zero-padded past each encoder's own length / past B)
#   w_in  : (4E, 16H)       block-structured input projection, gate-major columns
#   b     : (1, 16H)        fused bias (b_ih + b_hh per slot), gate-major
#   w_rec : (4H, 16H)       block-diagonal (per slot) recurrent weight, gate-major
#   gate-major column layout: [i | f | o | g], each 4H=128 wide, slot order
#   inside every gate group: [stack_f, stack_b, sent_f, sent_b], each H wide.
# --------------------------------------------------------------------------
def parser_kernel(xc_ref, w_in_ref, b_ref, w_rec_ref,
                  w_dstack_ref, b_dstack_ref, w_dsent_ref, b_dsent_ref,
                  w_head_s_ref, w_head_n_ref, b_act_ref, b_rel_ref,
                  action_ref, relation_ref, *, T0, T1):
    Bp = action_ref.shape[0]
    G1 = w_rec_ref.shape[0]            # 4H = combined state width = one gate group
    HW = G1 // 2                       # 2H = one encoder's (fwd||bwd) hidden width
    T_max = xc_ref.shape[0] // Bp
    A = b_act_ref.shape[1]

    # Hoisted input projection: one MXU matmul for all slots & timesteps.
    gin = (jnp.dot(xc_ref[...], w_in_ref[...],
                   preferred_element_type=jnp.float32)
           + b_ref[...])                                        # (T_max*Bp, 16H)
    w_rec = w_rec_ref[...]                                      # hoisted load

    h = jnp.zeros((Bp, G1), jnp.float32)   # [h_sf | h_sb | h_nf | h_nb]
    c = jnp.zeros((Bp, G1), jnp.float32)
    stack_hn = h[:, :HW]
    sent_hn = h[:, HW:]

    # Fully unrolled fused recurrence: one (Bp,128)x(128,512) MXU push per step,
    # 1 sigmoid + 2 tanh EUP passes, all slices 8-sublane / 128-lane aligned.
    for t in range(T_max):
        gates = gin[t * Bp:(t + 1) * Bp] + jnp.dot(
            h, w_rec, preferred_element_type=jnp.float32)       # (Bp, 16H)
        sg = jax.nn.sigmoid(gates[:, :3 * G1])                  # [i | f | o]
        g = jnp.tanh(gates[:, 3 * G1:])                         # [g]
        i = sg[:, :G1]
        f = sg[:, G1:2 * G1]
        o = sg[:, 2 * G1:]
        c = f * c + i * g
        h = o * jnp.tanh(c)
        # Capture each encoder's final hidden at its own last real step; the
        # fused state keeps running (on zero-padded input) but is unused after.
        if t == T0 - 1:
            stack_hn = h[:, :HW]                                # [h_sf | h_sb]
        if t == T1 - 1:
            sent_hn = h[:, HW:]                                 # [h_nf | h_nb]

    # Dense heads (dropout == identity at inference).
    stack_d = jnp.tanh(jnp.dot(stack_hn, w_dstack_ref[...],
                               preferred_element_type=jnp.float32)
                       + b_dstack_ref[...])
    sent_d = jnp.tanh(jnp.dot(sent_hn, w_dsent_ref[...],
                              preferred_element_type=jnp.float32)
                      + b_dsent_ref[...])

    # Fused action|relation head: encoded = cat([stack_d, sent_d], 1) folded
    # into two matmuls against (D, A+R) weights -> one logits slab.
    logits = (jnp.dot(stack_d, w_head_s_ref[...], preferred_element_type=jnp.float32)
              + jnp.dot(sent_d, w_head_n_ref[...], preferred_element_type=jnp.float32))
    action_ref[...] = jax.nn.softmax(logits[:, :A] + b_act_ref[...], axis=1)
    relation_ref[...] = jax.nn.softmax(logits[:, A:] + b_rel_ref[...], axis=1)


# --------------------------------------------------------------------------
# One-time weight fusion / pre-transposition (wrapper side, host/trace time).
# --------------------------------------------------------------------------
def prepare_params(params):
    H = params["lstm_hidden_size"]
    E = params["lstm_stack"]["wih_f"].shape[1]
    D = params["w_dstack"].shape[0]

    # Slot order inside the fused recurrence: [stack_f, stack_b, sent_f, sent_b]
    slots = [
        (params["lstm_stack"]["wih_f"], params["lstm_stack"]["whh_f"], params["lstm_stack"]["b_f"]),
        (params["lstm_stack"]["wih_b"], params["lstm_stack"]["whh_b"], params["lstm_stack"]["b_b"]),
        (params["lstm_sent"]["wih_f"], params["lstm_sent"]["whh_f"], params["lstm_sent"]["b_f"]),
        (params["lstm_sent"]["wih_b"], params["lstm_sent"]["whh_b"], params["lstm_sent"]["b_b"]),
    ]
    S = len(slots)
    G1 = S * H                       # one gate group width (= fused state width)
    GATE_PERM = (0, 1, 3, 2)         # desired [i,f,o,g] -> PyTorch [i,f,g,o] indices

    # NOTE(synk): when importing real PyTorch LSTM weights, b = b_ih + b_hh
    # must be summed explicitly before passing it here.
    w_in = np.zeros((S * E, 4 * G1), np.float32)
    w_rec = np.zeros((S * H, 4 * G1), np.float32)
    b = np.zeros((1, 4 * G1), np.float32)
    for s, (wih, whh, bias) in enumerate(slots):
        wih_t = np.asarray(wih).T        # (E, 4H) PyTorch gate order
        whh_t = np.asarray(whh).T        # (H, 4H)
        bias = np.asarray(bias)          # (1, 4H)
        for gd, gp in enumerate(GATE_PERM):
            cols = slice(gd * G1 + s * H, gd * G1 + (s + 1) * H)
            w_in[s * E:(s + 1) * E, cols] = wih_t[:, gp * H:(gp + 1) * H]
            w_rec[s * H:(s + 1) * H, cols] = whh_t[:, gp * H:(gp + 1) * H]
            b[:, cols] = bias[:, gp * H:(gp + 1) * H]

    # Fused dense heads: action|relation concatenated along output axis,
    # pre-split into stack/sent input halves and pre-transposed.
    w_act = np.asarray(params["w_act"])
    w_rel = np.asarray(params["w_rel"])
    w_head_stack = np.concatenate([w_act[:, :D].T, w_rel[:, :D].T], axis=1)   # (D, A+R)
    w_head_sent = np.concatenate([w_act[:, D:].T, w_rel[:, D:].T], axis=1)    # (D, A+R)

    return {
        "embedding": params["embedding"],
        "w_in": jnp.asarray(w_in), "b_gates": jnp.asarray(b), "w_rec": jnp.asarray(w_rec),
        "w_dstack_t": params["w_dstack"].T, "b_dstack": params["b_dstack"],
        "w_dsent_t": params["w_dsent"].T, "b_dsent": params["b_dsent"],
        "w_head_stack": jnp.asarray(w_head_stack),
        "w_head_sent": jnp.asarray(w_head_sent),
        "b_act": params["b_act"], "b_rel": params["b_rel"],
    }


# --------------------------------------------------------------------------
# Full forward pass: embedding gather + slot pairing in XLA (tiny), one fused
# Pallas launch for everything else.
# --------------------------------------------------------------------------
def parser_forward(x_stack_idx, x_sent_idx, fp):
    emb = fp["embedding"]                                    # (V, E)
    B, T0 = x_stack_idx.shape
    T1 = x_sent_idx.shape[1]
    T_max = max(T0, T1)
    Bp = max(8, ((B + 7) // 8) * 8)                          # pad batch to sublane count

    def embed_tm(idx):
        return jnp.transpose(emb[idx], (1, 0, 2))            # (T, B, E) time-major

    def pad_tb(x, T):
        return jnp.pad(x, ((0, T_max - T), (0, Bp - B), (0, 0)))

    x0 = embed_tm(x_stack_idx)                               # (T0, B, E)
    x1 = embed_tm(x_sent_idx)                                # (T1, B, E)
    # Per-slot input: [stack_fwd | stack_bwd | sent_fwd | sent_bwd]; backward
    # slots see the time-reversed sequence; padding past each length is zero.
    xc = jnp.concatenate(
        [pad_tb(x0, T0), pad_tb(x0[::-1], T0),
         pad_tb(x1, T1), pad_tb(x1[::-1], T1)], axis=-1)     # (T_max, Bp, 4E)
    xc = xc.reshape(T_max * Bp, -1)

    A = fp["b_act"].shape[1]
    R = fp["b_rel"].shape[1]
    vmem = pl.BlockSpec(memory_space=pltpu.MemorySpace.VMEM)

    action_p, relation_p = pl.pallas_call(
        functools.partial(parser_kernel, T0=T0, T1=T1),
        out_shape=(jax.ShapeDtypeStruct((Bp, A), jnp.float32),
                   jax.ShapeDtypeStruct((Bp, R), jnp.float32)),
        in_specs=[vmem] * 12,
        out_specs=(vmem, vmem),
    )(xc,
      fp["w_in"], fp["b_gates"], fp["w_rec"],
      fp["w_dstack_t"], fp["b_dstack"], fp["w_dsent_t"], fp["b_dsent"],
      fp["w_head_stack"], fp["w_head_sent"], fp["b_act"], fp["b_rel"])
    return [action_p[:B], relation_p[:B]]


# --------------------------------------------------------------------------
# Pure-JAX reference (for correctness check) — original (unfused) weights.
# --------------------------------------------------------------------------
def _lstm_dir_ref(x_tbe, wih, whh, b, H):
    B = x_tbe.shape[1]

    def step(carry, x_t):
        h, c = carry
        gates = x_t @ wih.T + h @ whh.T + b
        i = jax.nn.sigmoid(gates[:, :H])
        f = jax.nn.sigmoid(gates[:, H:2 * H])
        g = jnp.tanh(gates[:, 2 * H:3 * H])
        o = jax.nn.sigmoid(gates[:, 3 * H:])
        c = f * c + i * g
        h = o * jnp.tanh(c)
        return (h, c), None

    (h, _), _ = lax.scan(step, (jnp.zeros((B, H)), jnp.zeros((B, H))), x_tbe)
    return h


def parser_forward_ref(x_stack_idx, x_sent_idx, params):
    emb = params["embedding"]
    H = params["lstm_hidden_size"]

    def encode(idx, lp):
        x = jnp.transpose(emb[idx], (1, 0, 2))
        h_f = _lstm_dir_ref(x, lp["wih_f"], lp["whh_f"], lp["b_f"], H)
        h_b = _lstm_dir_ref(x[::-1], lp["wih_b"], lp["whh_b"], lp["b_b"], H)
        return jnp.concatenate([h_f, h_b], axis=1)

    stack_hn = encode(x_stack_idx, params["lstm_stack"])
    sent_hn = encode(x_sent_idx, params["lstm_sent"])
    stack_d = jnp.tanh(stack_hn @ params["w_dstack"].T + params["b_dstack"])
    sent_d = jnp.tanh(sent_hn @ params["w_dsent"].T + params["b_dsent"])
    enc = jnp.concatenate([stack_d, sent_d], axis=1)
    a = jax.nn.softmax(enc @ params["w_act"].T + params["b_act"], axis=1)
    r = jax.nn.softmax(enc @ params["w_rel"].T + params["b_rel"], axis=1)
    return [a, r]


# --------------------------------------------------------------------------
# Deterministic parameter init (shapes match the PyTorch module __init__)
# --------------------------------------------------------------------------
def init_params(key, vocab, E, H, D, A, R):
    keys = jax.random.split(key, 32)
    k = iter(keys)

    def w(shape, scale=0.1):
        return jax.random.normal(next(k), shape, jnp.float32) * scale

    def lstm_dir():
        # b = b_ih + b_hh, kept as a single combined (1, 4H) bias
        return {"wih": w((4 * H, E)), "whh": w((4 * H, H)), "b": w((1, 4 * H))}

    def bilstm():
        f, b = lstm_dir(), lstm_dir()
        return {"wih_f": f["wih"], "whh_f": f["whh"], "b_f": f["b"],
                "wih_b": b["wih"], "whh_b": b["whh"], "b_b": b["b"]}

    return {
        "embedding": w((vocab, E), scale=1.0),      # wv.vectors
        "lstm_hidden_size": H,
        "lstm_stack": bilstm(),
        "lstm_sent": bilstm(),
        "w_dstack": w((D, 2 * H)), "b_dstack": w((1, D)),
        "w_dsent": w((D, 2 * H)), "b_dsent": w((1, D)),
        "w_act": w((A, 2 * D)), "b_act": w((1, A)),
        "w_rel": w((R, 2 * D)), "b_rel": w((1, R)),
    }


if __name__ == "__main__":
    # small shapes: batch=2, stack_seq=6, sent_seq=8, vocab=50,
    # input_size=16, lstm_hidden=32, hidden_dense=20, actions=5, relations=7
    B, T_STACK, T_SENT = 2, 6, 8
    VOCAB, E, H, D, A, R = 50, 16, 32, 20, 5, 7

    key = jax.random.PRNGKey(0)
    kp, k0, k1 = jax.random.split(key, 3)
    params = init_params(kp, VOCAB, E, H, D, A, R)
    fused_params = prepare_params(params)           # one-time weight fusion

    x_stack = jax.random.randint(k0, (B, T_STACK), 0, VOCAB)
    x_sent = jax.random.randint(k1, (B, T_SENT), 0, VOCAB)

    fwd = jax.jit(parser_forward)
    action_out, relation_out = fwd(x_stack, x_sent, fused_params)
    jax.block_until_ready(action_out)
    jax.block_until_ready(relation_out)

    # correctness check against pure-JAX reference
    a_ref, r_ref = parser_forward_ref(x_stack, x_sent, params)
    assert action_out.shape == (B, A) and relation_out.shape == (B, R)
    np.testing.assert_allclose(np.asarray(action_out), np.asarray(a_ref), atol=1e-5, rtol=1e-5)
    np.testing.assert_allclose(np.asarray(relation_out), np.asarray(r_ref), atol=1e-5, rtol=1e-5)
    np.testing.assert_allclose(np.asarray(action_out).sum(axis=1), 1.0, atol=1e-5)
    np.testing.assert_allclose(np.asarray(relation_out).sum(axis=1), 1.0, atol=1e-5)

    print("KERNEL_OK")
</pallas_src>

<mosaic_0001>
module attributes {stable_mosaic.version = 11 : i64} {
  func.func @parser_kernel(%arg0: memref<64x64xf32, #tpu.memory_space<vmem>>, %arg1: memref<64x512xf32, #tpu.memory_space<vmem>>, %arg2: memref<1x512xf32, #tpu.memory_space<vmem>>, %arg3: memref<128x512xf32, #tpu.memory_space<vmem>>, %arg4: memref<64x20xf32, #tpu.memory_space<vmem>>, %arg5: memref<1x20xf32, #tpu.memory_space<vmem>>, %arg6: memref<64x20xf32, #tpu.memory_space<vmem>>, %arg7: memref<1x20xf32, #tpu.memory_space<vmem>>, %arg8: memref<20x12xf32, #tpu.memory_space<vmem>>, %arg9: memref<20x12xf32, #tpu.memory_space<vmem>>, %arg10: memref<1x5xf32, #tpu.memory_space<vmem>>, %arg11: memref<1x7xf32, #tpu.memory_space<vmem>>, %arg12: memref<8x5xf32, #tpu.memory_space<vmem>>, %arg13: memref<8x7xf32, #tpu.memory_space<vmem>>) attributes {dimension_semantics = [], scalar_prefetch = 0 : i64, scratch_operands = 0 : i64, tpu.core_type = #tpu.core_type<tc>} {
    %c0 = arith.constant 0 : index
    %c0_0 = arith.constant 0 : index
    %0 = vector.load %arg0[%c0, %c0_0] : memref<64x64xf32, #tpu.memory_space<vmem>>, vector<64x64xf32>
    %c0_1 = arith.constant 0 : index
    %c0_2 = arith.constant 0 : index
    %1 = vector.load %arg1[%c0_1, %c0_2] : memref<64x512xf32, #tpu.memory_space<vmem>>, vector<64x512xf32>
    %cst = arith.constant dense<0.000000e+00> : vector<64x512xf32>
    %2 = tpu.matmul %0, %1, %cst {dimension_numbers = #tpu.dot_dimension_numbers<[1], [0], [0], [1], [0, 0, 1, 1], [], []>} : vector<64x64xf32>, vector<64x512xf32>, vector<64x512xf32> -> vector<64x512xf32>
    %c0_3 = arith.constant 0 : index
    %c0_4 = arith.constant 0 : index
    %3 = vector.load %arg2[%c0_3, %c0_4] : memref<1x512xf32, #tpu.memory_space<vmem>>, vector<1x512xf32>
    %4 = vector.broadcast %3 : vector<1x512xf32> to vector<64x512xf32>
    %5 = arith.addf %2, %4 : vector<64x512xf32>
    %c0_5 = arith.constant 0 : index
    %c0_6 = arith.constant 0 : index
    %6 = vector.load %arg3[%c0_5, %c0_6] : memref<128x512xf32, #tpu.memory_space<vmem>>, vector<128x512xf32>
    %cst_7 = arith.constant 0.000000e+00 : f32
    %7 = vector.broadcast %cst_7 : f32 to vector<8x128xf32>
    %cst_8 = arith.constant 0.000000e+00 : f32
    %8 = vector.broadcast %cst_8 : f32 to vector<8x128xf32>
    %9 = vector.extract_strided_slice %5 {offsets = [0, 0], sizes = [8, 512], strides = [1, 1]} : vector<64x512xf32> to vector<8x512xf32>
    %cst_9 = arith.constant dense<0.000000e+00> : vector<8x512xf32>
    %10 = tpu.matmul %7, %6, %cst_9 {dimension_numbers = #tpu.dot_dimension_numbers<[1], [0], [0], [1], [0, 0, 1, 1], [], []>} : vector<8x128xf32>, vector<128x512xf32>, vector<8x512xf32> -> vector<8x512xf32>
    %11 = arith.addf %9, %10 : vector<8x512xf32>
    %12 = vector.extract_strided_slice %11 {offsets = [0, 0], sizes = [8, 384], strides = [1, 1]} : vector<8x512xf32> to vector<8x384xf32>
    %13 = arith.negf %12 : vector<8x384xf32>
    %14 = math.exp %13 : vector<8x384xf32>
    %cst_10 = arith.constant 1.000000e+00 : f32
    %15 = vector.broadcast %cst_10 : f32 to vector<8x384xf32>
    %16 = arith.addf %15, %14 : vector<8x384xf32>
    %17 = arith.divf %15, %16 : vector<8x384xf32>
    %18 = vector.extract_strided_slice %11 {offsets = [0, 384], sizes = [8, 128], strides = [1, 1]} : vector<8x512xf32> to vector<8x128xf32>
    %19 = math.tanh %18 : vector<8x128xf32>
    %20 = vector.extract_strided_slice %17 {offsets = [0, 0], sizes = [8, 128], strides = [1, 1]} : vector<8x384xf32> to vector<8x128xf32>
    %21 = vector.extract_strided_slice %17 {offsets = [0, 128], sizes = [8, 128], strides = [1, 1]} : vector<8x384xf32> to vector<8x128xf32>
    %22 = vector.extract_strided_slice %17 {offsets = [0, 256], sizes = [8, 128], strides = [1, 1]} : vector<8x384xf32> to vector<8x128xf32>
    %23 = arith.mulf %21, %8 : vector<8x128xf32>
    %24 = arith.mulf %20, %19 : vector<8x128xf32>
    %25 = arith.addf %23, %24 : vector<8x128xf32>
    %26 = math.tanh %25 : vector<8x128xf32>
    %27 = arith.mulf %22, %26 : vector<8x128xf32>
    %28 = vector.extract_strided_slice %5 {offsets = [8, 0], sizes = [8, 512], strides = [1, 1]} : vector<64x512xf32> to vector<8x512xf32>
    %cst_11 = arith.constant dense<0.000000e+00> : vector<8x512xf32>
    %29 = tpu.matmul %27, %6, %cst_11 {dimension_numbers = #tpu.dot_dimension_numbers<[1], [0], [0], [1], [0, 0, 1, 1], [], []>} : vector<8x128xf32>, vector<128x512xf32>, vector<8x512xf32> -> vector<8x512xf32>
    %30 = arith.addf %28, %29 : vector<8x512xf32>
    %31 = vector.extract_strided_slice %30 {offsets = [0, 0], sizes = [8, 384], strides = [1, 1]} : vector<8x512xf32> to vector<8x384xf32>
    %32 = arith.negf %31 : vector<8x384xf32>
    %33 = math.exp %32 : vector<8x384xf32>
    %cst_12 = arith.constant 1.000000e+00 : f32
    %34 = vector.broadcast %cst_12 : f32 to vector<8x384xf32>
    %35 = arith.addf %34, %33 : vector<8x384xf32>
    %36 = arith.divf %34, %35 : vector<8x384xf32>
    %37 = vector.extract_strided_slice %30 {offsets = [0, 384], sizes = [8, 128], strides = [1, 1]} : vector<8x512xf32> to vector<8x128xf32>
    %38 = math.tanh %37 : vector<8x128xf32>
    %39 = vector.extract_strided_slice %36 {offsets = [0, 0], sizes = [8, 128], strides = [1, 1]} : vector<8x384xf32> to vector<8x128xf32>
    %40 = vector.extract_strided_slice %36 {offsets = [0, 128], sizes = [8, 128], strides = [1, 1]} : vector<8x384xf32> to vector<8x128xf32>
    %41 = vector.extract_strided_slice %36 {offsets = [0, 256], sizes = [8, 128], strides = [1, 1]} : vector<8x384xf32> to vector<8x128xf32>
    %42 = arith.mulf %40, %25 : vector<8x128xf32>
    %43 = arith.mulf %39, %38 : vector<8x128xf32>
    %44 = arith.addf %42, %43 : vector<8x128xf32>
    %45 = math.tanh %44 : vector<8x128xf32>
    %46 = arith.mulf %41, %45 : vector<8x128xf32>
    %47 = vector.extract_strided_slice %5 {offsets = [16, 0], sizes = [8, 512], strides = [1, 1]} : vector<64x512xf32> to vector<8x512xf32>
    %cst_13 = arith.constant dense<0.000000e+00> : vector<8x512xf32>
    %48 = tpu.matmul %46, %6, %cst_13 {dimension_numbers = #tpu.dot_dimension_numbers<[1], [0], [0], [1], [0, 0, 1, 1], [], []>} : vector<8x128xf32>, vector<128x512xf32>, vector<8x512xf32> -> vector<8x512xf32>
    %49 = arith.addf %47, %48 : vector<8x512xf32>
    %50 = vector.extract_strided_slice %49 {offsets = [0, 0], sizes = [8, 384], strides = [1, 1]} : vector<8x512xf32> to vector<8x384xf32>
    %51 = arith.negf %50 : vector<8x384xf32>
    %52 = math.exp %51 : vector<8x384xf32>
    %cst_14 = arith.constant 1.000000e+00 : f32
    %53 = vector.broadcast %cst_14 : f32 to vector<8x384xf32>
    %54 = arith.addf %53, %52 : vector<8x384xf32>
    %55 = arith.divf %53, %54 : vector<8x384xf32>
    %56 = vector.extract_strided_slice %49 {offsets = [0, 384], sizes = [8, 128], strides = [1, 1]} : vector<8x512xf32> to vector<8x128xf32>
    %57 = math.tanh %56 : vector<8x128xf32>
    %58 = vector.extract_strided_slice %55 {offsets = [0, 0], sizes = [8, 128], strides = [1, 1]} : vector<8x384xf32> to vector<8x128xf32>
    %59 = vector.extract_strided_slice %55 {offsets = [0, 128], sizes = [8, 128], strides = [1, 1]} : vector<8x384xf32> to vector<8x128xf32>
    %60 = vector.extract_strided_slice %55 {offsets = [0, 256], sizes = [8, 128], strides = [1, 1]} : vector<8x384xf32> to vector<8x128xf32>
    %61 = arith.mulf %59, %44 : vector<8x128xf32>
    %62 = arith.mulf %58, %57 : vector<8x128xf32>
    %63 = arith.addf %61, %62 : vector<8x128xf32>
    %64 = math.tanh %63 : vector<8x128xf32>
    %65 = arith.mulf %60, %64 : vector<8x128xf32>
    %66 = vector.extract_strided_slice %5 {offsets = [24, 0], sizes = [8, 512], strides = [1, 1]} : vector<64x512xf32> to vector<8x512xf32>
    %cst_15 = arith.constant dense<0.000000e+00> : vector<8x512xf32>
    %67 = tpu.matmul %65, %6, %cst_15 {dimension_numbers = #tpu.dot_dimension_numbers<[1], [0], [0], [1], [0, 0, 1, 1], [], []>} : vector<8x128xf32>, vector<128x512xf32>, vector<8x512xf32> -> vector<8x512xf32>
    %68 = arith.addf %66, %67 : vector<8x512xf32>
    %69 = vector.extract_strided_slice %68 {offsets = [0, 0], sizes = [8, 384], strides = [1, 1]} : vector<8x512xf32> to vector<8x384xf32>
    %70 = arith.negf %69 : vector<8x384xf32>
    %71 = math.exp %70 : vector<8x384xf32>
    %cst_16 = arith.constant 1.000000e+00 : f32
    %72 = vector.broadcast %cst_16 : f32 to vector<8x384xf32>
    %73 = arith.addf %72, %71 : vector<8x384xf32>
    %74 = arith.divf %72, %73 : vector<8x384xf32>
    %75 = vector.extract_strided_slice %68 {offsets = [0, 384], sizes = [8, 128], strides = [1, 1]} : vector<8x512xf32> to vector<8x128xf32>
    %76 = math.tanh %75 : vector<8x128xf32>
    %77 = vector.extract_strided_slice %74 {offsets = [0, 0], sizes = [8, 128], strides = [1, 1]} : vector<8x384xf32> to vector<8x128xf32>
    %78 = vector.extract_strided_slice %74 {offsets = [0, 128], sizes = [8, 128], strides = [1, 1]} : vector<8x384xf32> to vector<8x128xf32>
    %79 = vector.extract_strided_slice %74 {offsets = [0, 256], sizes = [8, 128], strides = [1, 1]} : vector<8x384xf32> to vector<8x128xf32>
    %80 = arith.mulf %78, %63 : vector<8x128xf32>
    %81 = arith.mulf %77, %76 : vector<8x128xf32>
    %82 = arith.addf %80, %81 : vector<8x128xf32>
    %83 = math.tanh %82 : vector<8x128xf32>
    %84 = arith.mulf %79, %83 : vector<8x128xf32>
    %85 = vector.extract_strided_slice %5 {offsets = [32, 0], sizes = [8, 512], strides = [1, 1]} : vector<64x512xf32> to vector<8x512xf32>
    %cst_17 = arith.constant dense<0.000000e+00> : vector<8x512xf32>
    %86 = tpu.matmul %84, %6, %cst_17 {dimension_numbers = #tpu.dot_dimension_numbers<[1], [0], [0], [1], [0, 0, 1, 1], [], []>} : vector<8x128xf32>, vector<128x512xf32>, vector<8x512xf32> -> vector<8x512xf32>
    %87 = arith.addf %85, %86 : vector<8x512xf32>
    %88 = vector.extract_strided_slice %87 {offsets = [0, 0], sizes = [8, 384], strides = [1, 1]} : vector<8x512xf32> to vector<8x384xf32>
    %89 = arith.negf %88 : vector<8x384xf32>
    %90 = math.exp %89 : vector<8x384xf32>
    %cst_18 = arith.constant 1.000000e+00 : f32
    %91 = vector.broadcast %cst_18 : f32 to vector<8x384xf32>
    %92 = arith.addf %91, %90 : vector<8x384xf32>
    %93 = arith.divf %91, %92 : vector<8x384xf32>
    %94 = vector.extract_strided_slice %87 {offsets = [0, 384], sizes = [8, 128], strides = [1, 1]} : vector<8x512xf32> to vector<8x128xf32>
    %95 = math.tanh %94 : vector<8x128xf32>
    %96 = vector.extract_strided_slice %93 {offsets = [0, 0], sizes = [8, 128], strides = [1, 1]} : vector<8x384xf32> to vector<8x128xf32>
    %97 = vector.extract_strided_slice %93 {offsets = [0, 128], sizes = [8, 128], strides = [1, 1]} : vector<8x384xf32> to vector<8x128xf32>
    %98 = vector.extract_strided_slice %93 {offsets = [0, 256], sizes = [8, 128], strides = [1, 1]} : vector<8x384xf32> to vector<8x128xf32>
    %99 = arith.mulf %97, %82 : vector<8x128xf32>
    %100 = arith.mulf %96, %95 : vector<8x128xf32>
    %101 = arith.addf %99, %100 : vector<8x128xf32>
    %102 = math.tanh %101 : vector<8x128xf32>
    %103 = arith.mulf %98, %102 : vector<8x128xf32>
    %104 = vector.extract_strided_slice %5 {offsets = [40, 0], sizes = [8, 512], strides = [1, 1]} : vector<64x512xf32> to vector<8x512xf32>
    %cst_19 = arith.constant dense<0.000000e+00> : vector<8x512xf32>
    %105 = tpu.matmul %103, %6, %cst_19 {dimension_numbers = #tpu.dot_dimension_numbers<[1], [0], [0], [1], [0, 0, 1, 1], [], []>} : vector<8x128xf32>, vector<128x512xf32>, vector<8x512xf32> -> vector<8x512xf32>
    %106 = arith.addf %104, %105 : vector<8x512xf32>
    %107 = vector.extract_strided_slice %106 {offsets = [0, 0], sizes = [8, 384], strides = [1, 1]} : vector<8x512xf32> to vector<8x384xf32>
    %108 = arith.negf %107 : vector<8x384xf32>
    %109 = math.exp %108 : vector<8x384xf32>
    %cst_20 = arith.constant 1.000000e+00 : f32
    %110 = vector.broadcast %cst_20 : f32 to vector<8x384xf32>
    %111 = arith.addf %110, %109 : vector<8x384xf32>
    %112 = arith.divf %110, %111 : vector<8x384xf32>
    %113 = vector.extract_strided_slice %106 {offsets = [0, 384], sizes = [8, 128], strides = [1, 1]} : vector<8x512xf32> to vector<8x128xf32>
    %114 = math.tanh %113 : vector<8x128xf32>
    %115 = vector.extract_strided_slice %112 {offsets = [0, 0], sizes = [8, 128], strides = [1, 1]} : vector<8x384xf32> to vector<8x128xf32>
    %116 = vector.extract_strided_slice %112 {offsets = [0, 128], sizes = [8, 128], strides = [1, 1]} : vector<8x384xf32> to vector<8x128xf32>
    %117 = vector.extract_strided_slice %112 {offsets = [0, 256], sizes = [8, 128], strides = [1, 1]} : vector<8x384xf32> to vector<8x128xf32>
    %118 = arith.mulf %116, %101 : vector<8x128xf32>
    %119 = arith.mulf %115, %114 : vector<8x128xf32>
    %120 = arith.addf %118, %119 : vector<8x128xf32>
    %121 = math.tanh %120 : vector<8x128xf32>
    %122 = arith.mulf %117, %121 : vector<8x128xf32>
    %123 = vector.extract_strided_slice %122 {offsets = [0, 0], sizes = [8, 64], strides = [1, 1]} : vector<8x128xf32> to vector<8x64xf32>
    %124 = vector.extract_strided_slice %5 {offsets = [48, 0], sizes = [8, 512], strides = [1, 1]} : vector<64x512xf32> to vector<8x512xf32>
    %cst_21 = arith.constant dense<0.000000e+00> : vector<8x512xf32>
    %125 = tpu.matmul %122, %6, %cst_21 {dimension_numbers = #tpu.dot_dimension_numbers<[1], [0], [0], [1], [0, 0, 1, 1], [], []>} : vector<8x128xf32>, vector<128x512xf32>, vector<8x512xf32> -> vector<8x512xf32>
    %126 = arith.addf %124, %125 : vector<8x512xf32>
    %127 = vector.extract_strided_slice %126 {offsets = [0, 0], sizes = [8, 384], strides = [1, 1]} : vector<8x512xf32> to vector<8x384xf32>
    %128 = arith.negf %127 : vector<8x384xf32>
    %129 = math.exp %128 : vector<8x384xf32>
    %cst_22 = arith.constant 1.000000e+00 : f32
    %130 = vector.broadcast %cst_22 : f32 to vector<8x384xf32>
    %131 = arith.addf %130, %129 : vector<8x384xf32>
    %132 = arith.divf %130, %131 : vector<8x384xf32>
    %133 = vector.extract_strided_slice %126 {offsets = [0, 384], sizes = [8, 128], strides = [1, 1]} : vector<8x512xf32> to vector<8x128xf32>
    %134 = math.tanh %133 : vector<8x128xf32>
    %135 = vector.extract_strided_slice %132 {offsets = [0, 0], sizes = [8, 128], strides = [1, 1]} : vector<8x384xf32> to vector<8x128xf32>
    %136 = vector.extract_strided_slice %132 {offsets = [0, 128], sizes = [8, 128], strides = [1, 1]} : vector<8x384xf32> to vector<8x128xf32>
    %137 = vector.extract_strided_slice %132 {offsets = [0, 256], sizes = [8, 128], strides = [1, 1]} : vector<8x384xf32> to vector<8x128xf32>
    %138 = arith.mulf %136, %120 : vector<8x128xf32>
    %139 = arith.mulf %135, %134 : vector<8x128xf32>
    %140 = arith.addf %138, %139 : vector<8x128xf32>
    %141 = math.tanh %140 : vector<8x128xf32>
    %142 = arith.mulf %137, %141 : vector<8x128xf32>
    %143 = vector.extract_strided_slice %5 {offsets = [56, 0], sizes = [8, 512], strides = [1, 1]} : vector<64x512xf32> to vector<8x512xf32>
    %cst_23 = arith.constant dense<0.000000e+00> : vector<8x512xf32>
    %144 = tpu.matmul %142, %6, %cst_23 {dimension_numbers = #tpu.dot_dimension_numbers<[1], [0], [0], [1], [0, 0, 1, 1], [], []>} : vector<8x128xf32>, vector<128x512xf32>, vector<8x512xf32> -> vector<8x512xf32>
    %145 = arith.addf %143, %144 : vector<8x512xf32>
    %146 = vector.extract_strided_slice %145 {offsets = [0, 0], sizes = [8, 384], strides = [1, 1]} : vector<8x512xf32> to vector<8x384xf32>
    %147 = arith.negf %146 : vector<8x384xf32>
    %148 = math.exp %147 : vector<8x384xf32>
    %cst_24 = arith.constant 1.000000e+00 : f32
    %149 = vector.broadcast %cst_24 : f32 to vector<8x384xf32>
    %150 = arith.addf %149, %148 : vector<8x384xf32>
    %151 = arith.divf %149, %150 : vector<8x384xf32>
    %152 = vector.extract_strided_slice %145 {offsets = [0, 384], sizes = [8, 128], strides = [1, 1]} : vector<8x512xf32> to vector<8x128xf32>
    %153 = math.tanh %152 : vector<8x128xf32>
    %154 = vector.extract_strided_slice %151 {offsets = [0, 0], sizes = [8, 128], strides = [1, 1]} : vector<8x384xf32> to vector<8x128xf32>
    %155 = vector.extract_strided_slice %151 {offsets = [0, 128], sizes = [8, 128], strides = [1, 1]} : vector<8x384xf32> to vector<8x128xf32>
    %156 = vector.extract_strided_slice %151 {offsets = [0, 256], sizes = [8, 128], strides = [1, 1]} : vector<8x384xf32> to vector<8x128xf32>
    %157 = arith.mulf %155, %140 : vector<8x128xf32>
    %158 = arith.mulf %154, %153 : vector<8x128xf32>
    %159 = arith.addf %157, %158 : vector<8x128xf32>
    %160 = math.tanh %159 : vector<8x128xf32>
    %161 = arith.mulf %156, %160 : vector<8x128xf32>
    %162 = vector.extract_strided_slice %161 {offsets = [0, 64], sizes = [8, 64], strides = [1, 1]} : vector<8x128xf32> to vector<8x64xf32>
    %c0_25 = arith.constant 0 : index
    %c0_26 = arith.constant 0 : index
    %163 = vector.load %arg4[%c0_25, %c0_26] : memref<64x20xf32, #tpu.memory_space<vmem>>, vector<64x20xf32>
    %cst_27 = arith.constant dense<0.000000e+00> : vector<8x20xf32>
    %164 = tpu.matmul %123, %163, %cst_27 {dimension_numbers = #tpu.dot_dimension_numbers<[1], [0], [0], [1], [0, 0, 1, 1], [], []>} : vector<8x64xf32>, vector<64x20xf32>, vector<8x20xf32> -> vector<8x20xf32>
    %c0_28 = arith.constant 0 : index
    %c0_29 = arith.constant 0 : index
    %165 = vector.load %arg5[%c0_28, %c0_29] : memref<1x20xf32, #tpu.memory_space<vmem>>, vector<1x20xf32>
    %166 = vector.broadcast %165 : vector<1x20xf32> to vector<8x20xf32>
    %167 = arith.addf %164, %166 : vector<8x20xf32>
    %168 = math.tanh %167 : vector<8x20xf32>
    %c0_30 = arith.constant 0 : index
    %c0_31 = arith.constant 0 : index
    %169 = vector.load %arg6[%c0_30, %c0_31] : memref<64x20xf32, #tpu.memory_space<vmem>>, vector<64x20xf32>
    %cst_32 = arith.constant dense<0.000000e+00> : vector<8x20xf32>
    %170 = tpu.matmul %162, %169, %cst_32 {dimension_numbers = #tpu.dot_dimension_numbers<[1], [0], [0], [1], [0, 0, 1, 1], [], []>} : vector<8x64xf32>, vector<64x20xf32>, vector<8x20xf32> -> vector<8x20xf32>
    %c0_33 = arith.constant 0 : index
    %c0_34 = arith.constant 0 : index
    %171 = vector.load %arg7[%c0_33, %c0_34] : memref<1x20xf32, #tpu.memory_space<vmem>>, vector<1x20xf32>
    %172 = vector.broadcast %171 : vector<1x20xf32> to vector<8x20xf32>
    %173 = arith.addf %170, %172 : vector<8x20xf32>
    %174 = math.tanh %173 : vector<8x20xf32>
    %c0_35 = arith.constant 0 : index
    %c0_36 = arith.constant 0 : index
    %175 = vector.load %arg8[%c0_35, %c0_36] : memref<20x12xf32, #tpu.memory_space<vmem>>, vector<20x12xf32>
    %cst_37 = arith.constant dense<0.000000e+00> : vector<8x12xf32>
    %176 = tpu.matmul %168, %175, %cst_37 {dimension_numbers = #tpu.dot_dimension_numbers<[1], [0], [0], [1], [0, 0, 1, 1], [], []>} : vector<8x20xf32>, vector<20x12xf32>, vector<8x12xf32> -> vector<8x12xf32>
    %c0_38 = arith.constant 0 : index
    %c0_39 = arith.constant 0 : index
    %177 = vector.load %arg9[%c0_38, %c0_39] : memref<20x12xf32, #tpu.memory_space<vmem>>, vector<20x12xf32>
    %cst_40 = arith.constant dense<0.000000e+00> : vector<8x12xf32>
    %178 = tpu.matmul %174, %177, %cst_40 {dimension_numbers = #tpu.dot_dimension_numbers<[1], [0], [0], [1], [0, 0, 1, 1], [], []>} : vector<8x20xf32>, vector<20x12xf32>, vector<8x12xf32> -> vector<8x12xf32>
    %179 = arith.addf %176, %178 : vector<8x12xf32>
    %180 = vector.extract_strided_slice %179 {offsets = [0, 0], sizes = [8, 5], strides = [1, 1]} : vector<8x12xf32> to vector<8x5xf32>
    %c0_41 = arith.constant 0 : index
    %c0_42 = arith.constant 0 : index
    %181 = vector.load %arg10[%c0_41, %c0_42] : memref<1x5xf32, #tpu.memory_space<vmem>>, vector<1x5xf32>
    %182 = vector.broadcast %181 : vector<1x5xf32> to vector<8x5xf32>
    %183 = arith.addf %180, %182 : vector<8x5xf32>
    %cst_43 = arith.constant dense<0xFF800000> : vector<8xf32>
    %184 = vector.multi_reduction <maximumf>, %183, %cst_43 [1] : vector<8x5xf32> to vector<8xf32>
    %cst_44 = arith.constant 0xFF800000 : f32
    %185 = vector.broadcast %cst_44 : f32 to vector<8xf32>
    %186 = arith.maximumf %185, %184 : vector<8xf32>
    %187 = vector.shape_cast %186 : vector<8xf32> to vector<8x1xf32>
    %188 = vector.broadcast %187 : vector<8x1xf32> to vector<8x5xf32>
    %189 = arith.subf %183, %188 : vector<8x5xf32>
    %190 = math.exp %189 : vector<8x5xf32>
    %cst_45 = arith.constant dense<0.000000e+00> : vector<8xf32>
    %191 = vector.multi_reduction <add>, %190, %cst_45 [1] : vector<8x5xf32> to vector<8xf32>
    %192 = vector.shape_cast %191 : vector<8xf32> to vector<8x1xf32>
    %193 = vector.broadcast %192 : vector<8x1xf32> to vector<8x5xf32>
    %194 = arith.divf %190, %193 : vector<8x5xf32>
    %c0_46 = arith.constant 0 : index
    %c0_47 = arith.constant 0 : index
    %195 = vector.load %arg12[%c0_46, %c0_47] : memref<8x5xf32, #tpu.memory_space<vmem>>, vector<8x5xf32>
    tpu.vector_store %arg12[%c0_46, %c0_47], %194 {strides = array<i32>} : memref<8x5xf32, #tpu.memory_space<vmem>>, vector<8x5xf32>,
    %196 = vector.extract_strided_slice %179 {offsets = [0, 5], sizes = [8, 7], strides = [1, 1]} : vector<8x12xf32> to vector<8x7xf32>
    %c0_48 = arith.constant 0 : index
    %c0_49 = arith.constant 0 : index
    %197 = vector.load %arg11[%c0_48, %c0_49] : memref<1x7xf32, #tpu.memory_space<vmem>>, vector<1x7xf32>
    %198 = vector.broadcast %197 : vector<1x7xf32> to vector<8x7xf32>
    %199 = arith.addf %196, %198 : vector<8x7xf32>
    %cst_50 = arith.constant dense<0xFF800000> : vector<8xf32>
    %200 = vector.multi_reduction <maximumf>, %199, %cst_50 [1] : vector<8x7xf32> to vector<8xf32>
    %cst_51 = arith.constant 0xFF800000 : f32
    %201 = vector.broadcast %cst_51 : f32 to vector<8xf32>
    %202 = arith.maximumf %201, %200 : vector<8xf32>
    %203 = vector.shape_cast %202 : vector<8xf32> to vector<8x1xf32>
    %204 = vector.broadcast %203 : vector<8x1xf32> to vector<8x7xf32>
    %205 = arith.subf %199, %204 : vector<8x7xf32>
    %206 = math.exp %205 : vector<8x7xf32>
    %cst_52 = arith.constant dense<0.000000e+00> : vector<8xf32>
    %207 = vector.multi_reduction <add>, %206, %cst_52 [1] : vector<8x7xf32> to vector<8xf32>
    %208 = vector.shape_cast %207 : vector<8xf32> to vector<8x1xf32>
    %209 = vector.broadcast %208 : vector<8x1xf32> to vector<8x7xf32>
    %210 = arith.divf %206, %209 : vector<8x7xf32>
    %c0_53 = arith.constant 0 : index
    %c0_54 = arith.constant 0 : index
    %211 = vector.load %arg13[%c0_53, %c0_54] : memref<8x7xf32, #tpu.memory_space<vmem>>, vector<8x7xf32>
    tpu.vector_store %arg13[%c0_53, %c0_54], %210 {strides = array<i32>} : memref<8x7xf32, #tpu.memory_space<vmem>>, vector<8x7xf32>,
    return
  }
}

</mosaic_0001>

<bundles_post_ra>
// kernel: parser_forward.1
= control target key start
LH: loop header
LB: loop body
LE: loop exit
PB: predicated region body
PF: predicated region fallthrough
CT: control target
= control target key end

     0   :  { %v3098_v3 = vmov 0.0   ;;  %vm105_vm0 = vcmask 523264   ;;  %vm3100_vm1 = vmmov 0   ;;  %vm1970_vm2 = vcmask 1043456   ;;  %s3102_s22 = smov 5   ;;  %s4047_s1 = inlined_call_operand.vmem [shape: f32[64,512], index: 1, kind: input, shape index: {}]   ;;  %s4048_s3 = inlined_call_operand.vmem [shape: f32[128,512], index: 3, kind: input, shape index: {}]   ;;  %s4049_s0 = inlined_call_operand.vmem [shape: f32[64,64], index: 0, kind: input, shape index: {}]   ;;  %s4050_s2 = inlined_call_operand.vmem [shape: f32[1,512], index: 2, kind: input, shape index: {}]   ;;  %s4051_s4 = inlined_call_operand.vmem [shape: f32[64,20], index: 4, kind: input, shape index: {}]   ;;  %s4052_s8 = inlined_call_operand.vmem [shape: f32[20,12], index: 8, kind: input, shape index: {}]   ;;  %s4053_s6 = inlined_call_operand.vmem [shape: f32[64,20], index: 6, kind: input, shape index: {}]   ;;  %s4054_s5 = inlined_call_operand.vmem [shape: f32[1,20], index: 5, kind: input, shape index: {}]   ;;  %s4055_s9 = inlined_call_operand.vmem [shape: f32[20,12], index: 9, kind: input, shape index: {}]   ;;  %s4056_s11 = inlined_call_operand.vmem [shape: f32[1,7], index: 11, kind: input, shape index: {}]   ;;  %s4057_s7 = inlined_call_operand.vmem [shape: f32[1,20], index: 7, kind: input, shape index: {}]   ;;  %s4058_s10 = inlined_call_operand.vmem [shape: f32[1,5], index: 10, kind: input, shape index: {}]   ;;  %s4059_s12 = inlined_call_operand.vmem [shape: f32[8,5], index: 12, kind: output, shape index: {0}]   ;;  %s4060_s13 = inlined_call_operand.vmem [shape: f32[8,7], index: 13, kind: output, shape index: {1}]  }
   0x1   :  { %v52_v0 = vld [vmem:[%s4047_s1 + $0x8] sm:$0xff]  ;;  %v54_v2 = vld [vmem:[%s4047_s1 + $0x18] sm:$0xff]  ;;  %194 = vmatprep.mubr.f32.mxu0 %v3098_v3  ;;  %307 = vmatprep.mubr.f32.mxu1 %v3098_v3  ;;  %v51_v6 = vld [vmem:[%s4047_s1] sm:$0xff]  ;;  %vm1966_vm3 = vcmask 162816   ;;  %vm2128_vm4 = vcmask 39936   ;;  %vm2151_vm5 = vcmask 97320  }
   0x2   :  { %v56_v1 = vld [vmem:[%s4047_s1 + $0x28] sm:$0xff]  ;;  %v58_v5 = vld [vmem:[%s4047_s1 + $0x38] sm:$0xff]  ;;  %v55_v7 = vld [vmem:[%s4047_s1 + $0x20] sm:$0xff]  ;;  %vm2162_vm6 = vcmask 56320  }
   0x3   :  { %v2313_v4 = vpack.c.bf16 %v56_v1, %v52_v0  ;;  %v2329_v8 = vpack.c.bf16 %v58_v5, %v54_v2  ;;  %v2315_v9 = vpack.c.bf16 %v55_v7, %v51_v6  ;;  %v53_v10 = vld [vmem:[%s4047_s1 + $0x10] sm:$0xff]  ;;  %v60_v12 = vld [vmem:[%s4047_s1 + $0x48] sm:$0xff]  ;;  %v62_v15 = vld [vmem:[%s4047_s1 + $0x58] sm:$0xff] }
   0x4   :  { %v57_v11 = vld [vmem:[%s4047_s1 + $0x30] sm:$0xff]  ;;  %v64_v14 = vld [vmem:[%s4047_s1 + $0x68] sm:$0xff]  ;;  %v66_v16 = vld [vmem:[%s4047_s1 + $0x78] sm:$0xff] }
   0x5   :  { %2314 = vmatprep.subr.bf16.mxu0 %v2313_v4  ;;  %v2331_v13 = vpack.c.bf16 %v57_v11, %v53_v10  ;;  %2330 = vmatprep.subr.bf16.mxu1 %v2329_v8  ;;  %v2317_v17 = vpack.c.bf16 %v64_v14, %v60_v12  ;;  %v2333_v18 = vpack.c.bf16 %v66_v16, %v62_v15  ;;  %v59_v19 = vld [vmem:[%s4047_s1 + $0x40] sm:$0xff]  ;;  %v61_v21 = vld [vmem:[%s4047_s1 + $0x50] sm:$0xff]  ;;  %v68_v24 = vld [vmem:[%s4047_s1 + $0x88] sm:$0xff] }
   0x6   :  { %2316 = vmatpush1.bf16.msra.mxu0 %v2315_v9  ;;  %v63_v20 = vld [vmem:[%s4047_s1 + $0x60] sm:$0xff]  ;;  %v65_v23 = vld [vmem:[%s4047_s1 + $0x70] sm:$0xff]  ;;  %v72_v25 = vld [vmem:[%s4047_s1 + $0xa8] sm:$0xff] }
   0x7   :  { %2332 = vmatpush1.bf16.msra.mxu1 %v2331_v13  ;;  %v2319_v22 = vpack.c.bf16 %v63_v20, %v59_v19  ;;  %2318 = vmatprep.subr.bf16.mxu0 %v2317_v17  ;;  %v2335_v26 = vpack.c.bf16 %v65_v23, %v61_v21  ;;  %v2321_v27 = vpack.c.bf16 %v72_v25, %v68_v24  ;;  %v70_v28 = vld [vmem:[%s4047_s1 + $0x98] sm:$0xff]  ;;  %v67_v30 = vld [vmem:[%s4047_s1 + $0x80] sm:$0xff]  ;;  %v69_v33 = vld [vmem:[%s4047_s1 + $0x90] sm:$0xff] }
   0x8   :  { %2334 = vmatprep.subr.bf16.mxu1 %v2333_v18  ;;  %v74_v29 = vld [vmem:[%s4047_s1 + $0xb8] sm:$0xff]  ;;  %v71_v32 = vld [vmem:[%s4047_s1 + $0xa0] sm:$0xff]  ;;  %v73_v34 = vld [vmem:[%s4047_s1 + $0xb0] sm:$0xff] }
   0x9   :  { %v2337_v31 = vpack.c.bf16 %v74_v29, %v70_v28  ;;  %v2323_v35 = vpack.c.bf16 %v71_v32, %v67_v30  ;;  %v76_v36 = vld [vmem:[%s4047_s1 + $0xc8] sm:$0xff]  ;;  %v78_v38 = vld [vmem:[%s4047_s1 + $0xd8] sm:$0xff]  ;;  %v2339_v39 = vpack.c.bf16 %v73_v34, %v69_v33  ;;  %v75_v42 = vld [vmem:[%s4047_s1 + $0xc0] sm:$0xff] }
   0xa   :  { %2320 = vmatpush1.bf16.msra.mxu0 %v2319_v22  ;;  %v80_v37 = vld [vmem:[%s4047_s1 + $0xe8] sm:$0xff]  ;;  %v82_v41 = vld [vmem:[%s4047_s1 + $0xf8] sm:$0xff]  ;;  %v79_v43 = vld [vmem:[%s4047_s1 + $0xe0] sm:$0xff] }
   0xb   :  { %2336 = vmatpush1.bf16.msra.mxu1 %v2335_v26  ;;  %2322 = vmatprep.subr.bf16.mxu0 %v2321_v27  ;;  %v2325_v40 = vpack.c.bf16 %v80_v37, %v76_v36  ;;  %v2341_v44 = vpack.c.bf16 %v82_v41, %v78_v38  ;;  %v77_v45 = vld [vmem:[%s4047_s1 + $0xd0] sm:$0xff]  ;;  %v357_v47 = vld [vmem:[%s4048_s3 + $0x8] sm:$0xff]  ;;  %v359_v49 = vld [vmem:[%s4048_s3 + $0x18] sm:$0xff]  ;;  %v2327_v50 = vpack.c.bf16 %v79_v43, %v75_v42 }
   0xc   :  { %2338 = vmatprep.subr.bf16.mxu1 %v2337_v31  ;;  %v81_v46 = vld [vmem:[%s4047_s1 + $0xf0] sm:$0xff]  ;;  %v361_v48 = vld [vmem:[%s4048_s3 + $0x28] sm:$0xff]  ;;  %v363_v51 = vld [vmem:[%s4048_s3 + $0x38] sm:$0xff] }
   0xd   :  { %v2343_v52 = vpack.c.bf16 %v81_v46, %v77_v45  ;;  %v3284_v53 = vpack.c.bf16 %v361_v48, %v357_v47  ;;  %v356_v54 = vld [vmem:[%s4048_s3] sm:$0xff]  ;;  %v3292_v56 = vpack.c.bf16 %v363_v51, %v359_v49  ;;  %v358_v57 = vld [vmem:[%s4048_s3 + $0x10] sm:$0xff]  ;;  %v365_v59 = vld [vmem:[%s4048_s3 + $0x48] sm:$0xff] }
   0xe   :  { %2324 = vmatpush1.bf16.msra.mxu0 %v2323_v35  ;;  %v360_v55 = vld [vmem:[%s4048_s3 + $0x20] sm:$0xff]  ;;  %v362_v58 = vld [vmem:[%s4048_s3 + $0x30] sm:$0xff]  ;;  %v369_v60 = vld [vmem:[%s4048_s3 + $0x68] sm:$0xff] }
   0xf   :  { %2340 = vmatpush1.bf16.msra.mxu1 %v2339_v39  ;;  %2326 = vmatprep.subr.bf16.mxu0 %v2325_v40  ;;  %v43_v61 = vld [vmem:[%s4049_s0] sm:$0xff]  ;;  %v3309_v62 = vpack.c.bf16 %v360_v55, %v356_v54  ;;  %v367_v63 = vld [vmem:[%s4048_s3 + $0x58] sm:$0xff]  ;;  %v3318_v1 = vpack.c.bf16 %v362_v58, %v358_v57  ;;  %v3327_v5 = vpack.c.bf16 %v369_v60, %v365_v59  ;;  %v366_v6 = vld [vmem:[%s4048_s3 + $0x50] sm:$0xff] }
  0x10   :  { %2342 = vmatprep.subr.bf16.mxu1 %v2341_v44  ;;  %v371_v0 = vld [vmem:[%s4048_s3 + $0x78] sm:$0xff]  ;;  %v364_v2 = vld [vmem:[%s4048_s3 + $0x40] sm:$0xff]  ;;  %v370_v7 = vld [vmem:[%s4048_s3 + $0x70] sm:$0xff] }
  0x11   :  { %v368_v4 = vld [vmem:[%s4048_s3 + $0x60] sm:$0xff]  ;;  %v3336_v8 = vpack.c.bf16 %v371_v0, %v367_v63  ;;  %v373_v9 = vld [vmem:[%s4048_s3 + $0x88] sm:$0xff]  ;;  %v375_v13 = vld [vmem:[%s4048_s3 + $0x98] sm:$0xff]  ;;  %v3359_v15 = vpack.c.bf16 %v370_v7, %v366_v6 }
  0x12   :  { %2328 = vmatpush1.bf16.msra.mxu0 %v2327_v50  ;;  %v377_v10 = vld [vmem:[%s4048_s3 + $0xa8] sm:$0xff]  ;;  %v3349_v12 = vpack.c.bf16 %v368_v4, %v364_v2  ;;  %v379_v14 = vld [vmem:[%s4048_s3 + $0xb8] sm:$0xff]  ;;  %v372_v16 = vld [vmem:[%s4048_s3 + $0x80] sm:$0xff] }
  0x13   :  { %2344 = vmatpush1.bf16.msra.mxu1 %v2343_v52  ;;  %2346 = vmatprep.subr.bf16.mxu0 %v3284_v53  ;;  %v44_v11 = vld [vmem:[%s4049_s0 + $0x8] sm:$0xff]  ;;  %v376_v17 = vld [vmem:[%s4048_s3 + $0xa0] sm:$0xff]  ;;  %v3369_v18 = vpack.c.bf16 %v377_v10, %v373_v9  ;;  %v374_v19 = vld [vmem:[%s4048_s3 + $0x90] sm:$0xff]  ;;  %v3379_v21 = vpack.c.bf16 %v379_v14, %v375_v13 }
  0x14   :  { %2378 = vmatprep.subr.bf16.mxu1 %v3292_v56  ;;  %v378_v20 = vld [vmem:[%s4048_s3 + $0xb0] sm:$0xff]  ;;  %v381_v22 = vld [vmem:[%s4048_s3 + $0xc8] sm:$0xff]  ;;  %v3392_v25 = vpack.c.bf16 %v376_v17, %v372_v16  ;;  %v383_v26 = vld [vmem:[%s4048_s3 + $0xd8] sm:$0xff] }
  0x15   :  { %2181 = vmatmul.mubr.msk.f32.vlgmr.msra.gmra.mrb[0].mxu0 %vm105_vm0, %v43_v61  ;;  %v385_v23 = vld [vmem:[%s4048_s3 + $0xe8] sm:$0xff]  ;;  %v45_v24 = vld [vmem:[%s4049_s0 + $0x10] sm:$0xff]  ;;  %v387_v27 = vld [vmem:[%s4048_s3 + $0xf8] sm:$0xff]  ;;  %v3402_v28 = vpack.c.bf16 %v378_v20, %v374_v19 }
  0x16   :  { %2189 = vmatmul.mubr.msk.f32.vlgmr.msra.gmra.mrb[0].mxu1 %vm105_vm0, %v43_v61  ;;  %2348 = vmatpush1.bf16.msra.mxu0 %v3309_v62  ;;  %v380_v29 = vld [vmem:[%s4048_s3 + $0xc0] sm:$0xff]  ;;  %v3412_v31 = vpack.c.bf16 %v385_v23, %v381_v22  ;;  %v382_v32 = vld [vmem:[%s4048_s3 + $0xd0] sm:$0xff]  ;;  %v3422_v34 = vpack.c.bf16 %v387_v27, %v383_v26  ;;  %v389_v35 = vld [vmem:[%s4048_s3 + $0x108] sm:$0xff] }
  0x17   :  { %2380 = vmatpush1.bf16.msra.mxu1 %v3318_v1  ;;  %200 = vmatprep.mubr.f32.mxu0 %v3098_v3  ;;  %v384_v30 = vld [vmem:[%s4048_s3 + $0xe0] sm:$0xff]  ;;  %v386_v33 = vld [vmem:[%s4048_s3 + $0xf0] sm:$0xff]  ;;  %v393_v36 = vld [vmem:[%s4048_s3 + $0x128] sm:$0xff] }
  0x18   :  { %313 = vmatprep.mubr.f32.mxu1 %v3098_v3  ;;  %2350 = vmatprep.subr.bf16.mxu0 %v3327_v5  ;;  %v46_v37 = vld [vmem:[%s4049_s0 + $0x18] sm:$0xff]  ;;  %v3435_v38 = vpack.c.bf16 %v384_v30, %v380_v29  ;;  %v3445_v41 = vpack.c.bf16 %v386_v33, %v382_v32  ;;  %v388_v42 = vld [vmem:[%s4048_s3 + $0x100] sm:$0xff]  ;;  %v3455_v44 = vpack.c.bf16 %v393_v36, %v389_v35  ;;  %v390_v45 = vld [vmem:[%s4048_s3 + $0x110] sm:$0xff] }
  0x19   :  { %2182 = vmatmul.mubr.msk.f32.gmra.mrb[2].mxu0 %vm105_vm0, %v44_v11  ;;  %2382 = vmatprep.subr.bf16.mxu1 %v3336_v8  ;;  %v391_v39 = vld [vmem:[%s4048_s3 + $0x118] sm:$0xff]  ;;  %v392_v43 = vld [vmem:[%s4048_s3 + $0x120] sm:$0xff]  ;;  %v394_v46 = vld [vmem:[%s4048_s3 + $0x130] sm:$0xff] }
  0x1a   :  { %2190 = vmatmul.mubr.msk.f32.gmra.mrb[2].mxu1 %vm105_vm0, %v44_v11  ;;  %2352 = vmatpush1.bf16.msra.mxu0 %v3349_v12  ;;  %v395_v40 = vld [vmem:[%s4048_s3 + $0x138] sm:$0xff]  ;;  %v397_v48 = vld [vmem:[%s4048_s3 + $0x148] sm:$0xff]  ;;  %v47_v50 = vld [vmem:[%s4049_s0 + $0x20] sm:$0xff]  ;;  %v3478_v51 = vpack.c.bf16 %v392_v43, %v388_v42  ;;  %v3488_v55 = vpack.c.bf16 %v394_v46, %v390_v45  ;;  %v85_v43 = vlaneseq }
  0x1b   :  { %2384 = vmatpush1.bf16.msra.mxu1 %v3359_v15  ;;  %206 = vmatprep.mubr.f32.mxu0 %v3098_v3  ;;  %v3465_v47 = vpack.c.bf16 %v395_v40, %v391_v39  ;;  %v401_v49 = vld [vmem:[%s4048_s3 + $0x168] sm:$0xff]  ;;  %v399_v52 = vld [vmem:[%s4048_s3 + $0x158] sm:$0xff]  ;;  %v396_v57 = vld [vmem:[%s4048_s3 + $0x140] sm:$0xff] }
  0x1c   :  { %319 = vmatprep.mubr.f32.mxu1 %v3098_v3  ;;  %2354 = vmatprep.subr.bf16.mxu0 %v3369_v18  ;;  %v403_v54 = vld [vmem:[%s4048_s3 + $0x178] sm:$0xff]  ;;  %v400_v58 = vld [vmem:[%s4048_s3 + $0x160] sm:$0xff]  ;;  %v3498_v59 = vpack.c.bf16 %v401_v49, %v397_v48  ;;  %v398_v60 = vld [vmem:[%s4048_s3 + $0x150] sm:$0xff]  ;;  %v86_v45 = vshrl.u32 %v85_v43, 7 }
  0x1d   :  { %2183 = vmatmul.mubr.msk.f32.gmra.mrb[4].mxu0 %vm105_vm0, %v45_v24  ;;  %2386 = vmatprep.subr.bf16.mxu1 %v3379_v21  ;;  %v402_v61 = vld [vmem:[%s4048_s3 + $0x170] sm:$0xff]  ;;  %v3508_v63 = vpack.c.bf16 %v403_v54, %v399_v52  ;;  %v405_v0 = vld [vmem:[%s4048_s3 + $0x188] sm:$0xff]  ;;  %v3521_v6 = vpack.c.bf16 %v400_v58, %v396_v57  ;;  %v407_v7 = vld [vmem:[%s4048_s3 + $0x198] sm:$0xff] }
  0x1e   :  { %2191 = vmatmul.mubr.msk.f32.gmra.mrb[4].mxu1 %vm105_vm0, %v45_v24  ;;  %2356 = vmatpush1.bf16.msra.mxu0 %v3392_v25  ;;  %v409_v2 = vld [vmem:[%s4048_s3 + $0x1a8] sm:$0xff]  ;;  %v411_v9 = vld [vmem:[%s4048_s3 + $0x1b8] sm:$0xff]  ;;  %v3531_v10 = vpack.c.bf16 %v402_v61, %v398_v60  ;;  %v404_v11 = vld [vmem:[%s4048_s3 + $0x180] sm:$0xff]  ;;  %v87_v46 = vsub.s32 0, %v86_v45  ;;  %v91_v49 = vsub.s32 1, %v86_v45  ;;  %v95_v57 = vsub.s32 2, %v86_v45 }
  0x1f   :  { %2388 = vmatpush1.bf16.msra.mxu1 %v3402_v28  ;;  %212 = vmatprep.mubr.f32.mxu0 %v3098_v3  ;;  %v48_v4 = vld [vmem:[%s4049_s0 + $0x28] sm:$0xff]  ;;  %v408_v13 = vld [vmem:[%s4048_s3 + $0x1a0] sm:$0xff]  ;;  %v3541_v14 = vpack.c.bf16 %v409_v2, %v405_v0  ;;  %v406_v16 = vld [vmem:[%s4048_s3 + $0x190] sm:$0xff]  ;;  %v3551_v19 = vpack.c.bf16 %v411_v9, %v407_v7 }
  0x20   :  { %325 = vmatprep.mubr.f32.mxu1 %v3098_v3  ;;  %2358 = vmatprep.subr.bf16.mxu0 %v3412_v31  ;;  %v410_v17 = vld [vmem:[%s4048_s3 + $0x1b0] sm:$0xff]  ;;  %v413_v20 = vld [vmem:[%s4048_s3 + $0x1c8] sm:$0xff]  ;;  %v3564_v24 = vpack.c.bf16 %v408_v13, %v404_v11  ;;  %v415_v26 = vld [vmem:[%s4048_s3 + $0x1d8] sm:$0xff]  ;;  %v99_v11 = vsub.s32 3, %v86_v45 }
  0x21   :  { %2184 = vmatmul.mubr.msk.f32.gmra.mrb[6].mxu0 %vm105_vm0, %v46_v37  ;;  %2390 = vmatprep.subr.bf16.mxu1 %v3422_v34  ;;  %v417_v22 = vld [vmem:[%s4048_s3 + $0x1e8] sm:$0xff]  ;;  %v49_v23 = vld [vmem:[%s4049_s0 + $0x30] sm:$0xff]  ;;  %v419_v27 = vld [vmem:[%s4048_s3 + $0x1f8] sm:$0xff]  ;;  %v3574_v29 = vpack.c.bf16 %v410_v17, %v406_v16 }
  0x22   :  { %2192 = vmatmul.mubr.msk.f32.gmra.mrb[6].mxu1 %vm105_vm0, %v46_v37  ;;  %2360 = vmatpush1.bf16.msra.mxu0 %v3435_v38  ;;  %v412_v30 = vld [vmem:[%s4048_s3 + $0x1c0] sm:$0xff]  ;;  %v3584_v33 = vpack.c.bf16 %v417_v22, %v413_v20  ;;  %v414_v35 = vld [vmem:[%s4048_s3 + $0x1d0] sm:$0xff]  ;;  %v3594_v37 = vpack.c.bf16 %v419_v27, %v415_v26  ;;  %v50_v39 = vld [vmem:[%s4049_s0 + $0x38] sm:$0xff] }
  0x23   :  { %2392 = vmatpush1.bf16.msra.mxu1 %v3445_v41  ;;  %218 = vmatprep.mubr.f32.mxu0 %v3098_v3  ;;  %v416_v32 = vld [vmem:[%s4048_s3 + $0x1e0] sm:$0xff]  ;;  %v418_v36 = vld [vmem:[%s4048_s3 + $0x1f0] sm:$0xff] }
  0x24   :  { %331 = vmatprep.mubr.f32.mxu1 %v3098_v3  ;;  %2362 = vmatprep.subr.bf16.mxu0 %v3455_v44  ;;  %v3601_v40 = vpack.c.bf16 %v416_v32, %v412_v30  ;;  %v3605_v42 = vpack.c.bf16 %v418_v36, %v414_v35  ;;  %v83_v48 = vld [vmem:[%s4050_s2] sm:$0xf] }
  0x25   :  { %2185 = vmatmul.mubr.msk.f32.gmra.mrb[8].mxu0 %vm105_vm0, %v47_v50  ;;  %2394 = vmatprep.subr.bf16.mxu1 %v3465_v47  ;;  %v3659_v52 = vrot.slane %v83_v48, %v91_v49  ;;  %v3663_v7 = vrot.slane %v83_v48, %v95_v57  ;;  %v3666_v16 = vrot.slane %v83_v48, %v99_v11 }
  0x26   :  { %2193 = vmatmul.mubr.msk.f32.gmra.mrb[8].mxu1 %vm105_vm0, %v47_v50  ;;  %2364 = vmatpush1.bf16.msra.mxu0 %v3478_v51  ;;  %v3657_v50 = vrot.slane %v83_v48, %v87_v46 }
  0x27   :  { %2396 = vmatpush1.bf16.msra.mxu1 %v3488_v55  ;;  %224 = vmatprep.mubr.f32.mxu0 %v3098_v3 }
  0x28   :  { %337 = vmatprep.mubr.f32.mxu1 %v3098_v3  ;;  %2366 = vmatprep.subr.bf16.mxu0 %v3498_v59 }
  0x29   :  { %2186 = vmatmul.mubr.msk.f32.gmra.mrb[10].mxu0 %vm105_vm0, %v48_v4  ;;  %2398 = vmatprep.subr.bf16.mxu1 %v3508_v63 }
  0x2a   :  { %2194 = vmatmul.mubr.msk.f32.gmra.mrb[10].mxu1 %vm105_vm0, %v48_v4  ;;  %2368 = vmatpush1.bf16.msra.mxu0 %v3521_v6 }
  0x2b   :  { %2400 = vmatpush1.bf16.msra.mxu1 %v3531_v10  ;;  %230 = vmatprep.mubr.f32.mxu0 %v3098_v3 }
  0x2c   :  { %343 = vmatprep.mubr.f32.mxu1 %v3098_v3  ;;  %2370 = vmatprep.subr.bf16.mxu0 %v3541_v14 }
  0x2d   :  { %2187 = vmatmul.mubr.msk.f32.gmra.mrb[12].mxu0 %vm105_vm0, %v49_v23  ;;  %2402 = vmatprep.subr.bf16.mxu1 %v3551_v19 }
  0x2e   :  { %2195 = vmatmul.mubr.msk.f32.gmra.mrb[12].mxu1 %vm105_vm0, %v49_v23  ;;  %2372 = vmatpush1.bf16.msra.mxu0 %v3564_v24 }
  0x2f   :  { %2404 = vmatpush1.bf16.msra.mxu1 %v3574_v29  ;;  %236 = vmatprep.mubr.f32.mxu0 %v3098_v3 }
  0x30   :  { %349 = vmatprep.mubr.f32.mxu1 %v3098_v3  ;;  %2374 = vmatprep.subr.bf16.mxu0 %v3584_v33 }
  0x31   :  { %2188 = vmatmul.mubr.msk.f32.gmra.mrb[14].mxu0 %vm105_vm0, %v50_v39  ;;  %2406 = vmatprep.subr.bf16.mxu1 %v3594_v37 }
  0x32   :  { %2196 = vmatmul.mubr.msk.f32.gmra.mrb[14].mxu1 %vm105_vm0, %v50_v39  ;;  %2376 = vmatpush1.bf16.msra.mxu0 %v3601_v40 }
  0x33   :  { %2408 = vmatpush1.bf16.msra.mxu1 %v3605_v42  ;;  %484 = vmatprep.mubr.f32.mxu0 %v3098_v3 }
  0x34   :  { %555 = vmatprep.mubr.f32.mxu1 %v3098_v3  ;;  %2410 = vmatprep.subr.bf16.mxu0 %v3284_v53 }
  0x35   :  { %485 = vmatmul.mubr.f32.vlgmr.msra.gmra.mrb[0].mxu0 %v3098_v3  ;;  %2442 = vmatprep.subr.bf16.mxu1 %v3292_v56 }
  0x36   :  { %556 = vmatmul.mubr.f32.vlgmr.msra.gmra.mrb[0].mxu1 %v3098_v3  ;;  %2412 = vmatpush1.bf16.msra.mxu0 %v3309_v62 }
  0x37   :  { %2444 = vmatpush1.bf16.msra.mxu1 %v3318_v1  ;;  %2414 = vmatprep.subr.bf16.mxu0 %v3327_v5 }
  0x38   :  { %2446 = vmatprep.subr.bf16.mxu1 %v3336_v8  ;;  %654 = vmatprep.mubr.f32.mxu0 %v3098_v3 }
  0x39   :  { %725 = vmatprep.mubr.f32.mxu1 %v3098_v3 }
  0x3a   :  { %2416 = vmatpush1.bf16.msra.mxu0 %v3349_v12 }
  0x3b   :  { %2448 = vmatpush1.bf16.msra.mxu1 %v3359_v15  ;;  %2418 = vmatprep.subr.bf16.mxu0 %v3369_v18 }
  0x3c   :  { %2450 = vmatprep.subr.bf16.mxu1 %v3379_v21 }
  0x3e   :  { %2420 = vmatpush1.bf16.msra.mxu0 %v3392_v25 }
  0x3f   :  { %2452 = vmatpush1.bf16.msra.mxu1 %v3402_v28  ;;  %2422 = vmatprep.subr.bf16.mxu0 %v3412_v31 }
  0x40   :  { %2454 = vmatprep.subr.bf16.mxu1 %v3422_v34 }
  0x42   :  { %2424 = vmatpush1.bf16.msra.mxu0 %v3435_v38 }
  0x43   :  { %2456 = vmatpush1.bf16.msra.mxu1 %v3445_v41  ;;  %2426 = vmatprep.subr.bf16.mxu0 %v3455_v44 }
  0x44   :  { %2458 = vmatprep.subr.bf16.mxu1 %v3465_v47 }
  0x46   :  { %2428 = vmatpush1.bf16.msra.mxu0 %v3478_v51 }
  0x47   :  { %2460 = vmatpush1.bf16.msra.mxu1 %v3488_v55  ;;  %2430 = vmatprep.subr.bf16.mxu0 %v3498_v59 }
  0x48   :  { %2462 = vmatprep.subr.bf16.mxu1 %v3508_v63 }
  0x4a   :  { %2432 = vmatpush1.bf16.msra.mxu0 %v3521_v6 }
  0x4b   :  { %2464 = vmatpush1.bf16.msra.mxu1 %v3531_v10  ;;  %2434 = vmatprep.subr.bf16.mxu0 %v3541_v14 }
  0x4c   :  { %2466 = vmatprep.subr.bf16.mxu1 %v3551_v19 }
  0x4e   :  { %2436 = vmatpush1.bf16.msra.mxu0 %v3564_v24 }
  0x4f   :  { %2468 = vmatpush1.bf16.msra.mxu1 %v3574_v29  ;;  %2438 = vmatprep.subr.bf16.mxu0 %v3584_v33 }
  0x50   :  { %2470 = vmatprep.subr.bf16.mxu1 %v3594_v37 }
  0x52   :  { %2440 = vmatpush1.bf16.msra.mxu0 %v3601_v40 }
  0x53   :  { %2472 = vmatpush1.bf16.msra.mxu1 %v3605_v42  ;;  %2474 = vmatprep.subr.bf16.mxu0 %v3284_v53 }
  0x54   :  { %2506 = vmatprep.subr.bf16.mxu1 %v3292_v56 }
 0x108   :  { %v486_v54 = vpop.f32.mrb[0].mxu0 }
 0x109   :  { %v2887_v58 = vadd.f32 %v486_v54, %v3657_v50  ;;  %v557_v60 = vpop.f32.mrb[0].mxu1  ;;  %v488_v61 = vpop.f32.mrb[1].mxu0 }
 0x10a   :  { %v2888_v0 = vadd.f32 %v488_v61, %v3659_v52  ;;  %v559_v2 = vpop.f32.mrb[1].mxu1  ;;  %v2903_v13 = vadd.f32 %v557_v60, %v3663_v7 }
 0x10b   :  { %v2197_v4 = vmul.f32 -1.442695, %v2887_v58  ;;  %v2904_v20 = vadd.f32 %v559_v2, %v3666_v16 }
 0x10c   :  { %v2198_v9 = vmul.f32 -1.442695, %v2888_v0  ;;  %v2199_v17 = vmul.f32 -1.442695, %v2903_v13 }
 0x10d   :  { %2958 = vpow2.f32 %v2197_v4 }
 0x10e   :  { %2960 = vpow2.f32 %v2198_v9 }
 0x10f   :  { %2962 = vpow2.f32 %v2199_v17 }
 0x110   :  { %2964 = vtanh.f32 %v2904_v20 }
 0x117   :  { %v2959_v22 = vpop.eup %2958 }
 0x118   :  { %v575_v23 = vadd.f32 1.0, %v2959_v22  ;;  %v2961_v26 = vpop.eup %2960 }
 0x119   :  { %v576_v27 = vadd.f32 1.0, %v2961_v26  ;;  %v2963_v30 = vpop.eup %2962 }
 0x11a   :  { %2966 = vrcp.f32 %v575_v23  ;;  %v2965_v32 = vpop.eup %2964  ;;  %v577_v43 = vadd.f32 1.0, %v2963_v30 }
 0x11b   :  { %2968 = vrcp.f32 %v576_v27 }
 0x11c   :  { %2970 = vrcp.f32 %v577_v43 }
 0x124   :  { %v2967_v35 = vpop.eup %2966 }
 0x125   :  { %v586_v36 = vmul.f32 %v2967_v35, %v2965_v32  ;;  %v2969_v39 = vpop.eup %2968 }
 0x126   :  { %v585_v45 = vmul.f32 0.0, %v2969_v39  ;;  %v2971_v48 = vpop.eup %2970 }
 0x128   :  { %v3669_v46 = vadd.f32 %v586_v36, %v585_v45 }
 0x12a   :  { %2972 = vtanh.f32 %v3669_v46 }
 0x134   :  { %v2973_v49 = vpop.eup %2972 }
 0x135   :  { %v589_v54 = vmul.f32 %v2973_v49, %v2971_v48 }
 0x137   :  { %655 = vmatmul.mubr.f32.vlgmr.msra.gmra.mrb[2].mxu0 %v589_v54  ;;  %726 = vmatmul.mubr.f32.vlgmr.msra.gmra.mrb[2].mxu1 %v589_v54 }
 0x138   :  { %2476 = vmatpush1.bf16.msra.mxu0 %v3309_v62  ;;  %2508 = vmatpush1.bf16.msra.mxu1 %v3318_v1 }
 0x139   :  { %2478 = vmatprep.subr.bf16.mxu0 %v3327_v5  ;;  %2510 = vmatprep.subr.bf16.mxu1 %v3336_v8 }
 0x13a   :  { %824 = vmatprep.mubr.f32.mxu0 %v3098_v3  ;;  %895 = vmatprep.mubr.f32.mxu1 %v3098_v3 }
 0x13c   :  { %2480 = vmatpush1.bf16.msra.mxu0 %v3349_v12  ;;  %2512 = vmatpush1.bf16.msra.mxu1 %v3359_v15 }
 0x13d   :  { %2482 = vmatprep.subr.bf16.mxu0 %v3369_v18  ;;  %2514 = vmatprep.subr.bf16.mxu1 %v3379_v21 }
 0x140   :  { %2484 = vmatpush1.bf16.msra.mxu0 %v3392_v25  ;;  %2516 = vmatpush1.bf16.msra.mxu1 %v3402_v28 }
 0x141   :  { %2486 = vmatprep.subr.bf16.mxu0 %v3412_v31  ;;  %2518 = vmatprep.subr.bf16.mxu1 %v3422_v34 }
 0x144   :  { %2488 = vmatpush1.bf16.msra.mxu0 %v3435_v38  ;;  %2520 = vmatpush1.bf16.msra.mxu1 %v3445_v41 }
 0x145   :  { %2490 = vmatprep.subr.bf16.mxu0 %v3455_v44  ;;  %2522 = vmatprep.subr.bf16.mxu1 %v3465_v47 }
 0x148   :  { %2492 = vmatpush1.bf16.msra.mxu0 %v3478_v51  ;;  %2524 = vmatpush1.bf16.msra.mxu1 %v3488_v55 }
 0x149   :  { %2494 = vmatprep.subr.bf16.mxu0 %v3498_v59  ;;  %2526 = vmatprep.subr.bf16.mxu1 %v3508_v63 }
 0x14c   :  { %2496 = vmatpush1.bf16.msra.mxu0 %v3521_v6  ;;  %2528 = vmatpush1.bf16.msra.mxu1 %v3531_v10 }
 0x14d   :  { %2498 = vmatprep.subr.bf16.mxu0 %v3541_v14  ;;  %2530 = vmatprep.subr.bf16.mxu1 %v3551_v19 }
 0x150   :  { %2500 = vmatpush1.bf16.msra.mxu0 %v3564_v24  ;;  %2532 = vmatpush1.bf16.msra.mxu1 %v3574_v29 }
 0x151   :  { %2502 = vmatprep.subr.bf16.mxu0 %v3584_v33  ;;  %2534 = vmatprep.subr.bf16.mxu1 %v3594_v37 }
 0x154   :  { %2504 = vmatpush1.bf16.msra.mxu0 %v3601_v40  ;;  %2536 = vmatpush1.bf16.msra.mxu1 %v3605_v42 }
 0x155   :  { %2538 = vmatprep.subr.bf16.mxu0 %v3284_v53  ;;  %2570 = vmatprep.subr.bf16.mxu1 %v3292_v56 }
 0x20a   :  { %v656_v57 = vpop.f32.mrb[2].mxu0  ;;  %v727_v58 = vpop.f32.mrb[2].mxu1 }
 0x20b   :  { %v2889_v60 = vadd.f32 %v656_v57, %v3657_v50  ;;  %v658_v61 = vpop.f32.mrb[3].mxu0  ;;  %v729_v0 = vpop.f32.mrb[3].mxu1  ;;  %v2905_v11 = vadd.f32 %v727_v58, %v3663_v7 }
 0x20c   :  { %v2890_v2 = vadd.f32 %v658_v61, %v3659_v52  ;;  %v2906_v13 = vadd.f32 %v729_v0, %v3666_v16 }
 0x20d   :  { %v2200_v4 = vmul.f32 -1.442695, %v2889_v60  ;;  %v2202_v17 = vmul.f32 -1.442695, %v2905_v11 }
 0x20e   :  { %v2201_v9 = vmul.f32 -1.442695, %v2890_v2 }
 0x20f   :  { %2974 = vpow2.f32 %v2200_v4 }
 0x210   :  { %2976 = vpow2.f32 %v2201_v9 }
 0x211   :  { %2978 = vtanh.f32 %v2906_v13 }
 0x212   :  { %2980 = vpow2.f32 %v2202_v17 }
 0x219   :  { %v2975_v20 = vpop.eup %2974 }
 0x21a   :  { %v745_v22 = vadd.f32 1.0, %v2975_v20  ;;  %v2977_v23 = vpop.eup %2976 }
 0x21b   :  { %v746_v26 = vadd.f32 1.0, %v2977_v23  ;;  %v2979_v27 = vpop.eup %2978 }
 0x21c   :  { %2982 = vrcp.f32 %v745_v22  ;;  %v2981_v30 = vpop.eup %2980 }
 0x21d   :  { %2984 = vrcp.f32 %v746_v26  ;;  %v747_v39 = vadd.f32 1.0, %v2981_v30 }
 0x21f   :  { %2986 = vrcp.f32 %v747_v39 }
 0x226   :  { %v2983_v32 = vpop.eup %2982 }
 0x227   :  { %v756_v35 = vmul.f32 %v2983_v32, %v2979_v27  ;;  %v2985_v36 = vpop.eup %2984 }
 0x228   :  { %v755_v43 = vmul.f32 %v2985_v36, %v3669_v46 }
 0x229   :  { %v2987_v48 = vpop.eup %2986 }
 0x22a   :  { %v3711_v45 = vadd.f32 %v756_v35, %v755_v43 }
 0x22c   :  { %2988 = vtanh.f32 %v3711_v45 }
 0x236   :  { %v2989_v49 = vpop.eup %2988 }
 0x237   :  { %v759_v54 = vmul.f32 %v2989_v49, %v2987_v48 }
 0x239   :  { %825 = vmatmul.mubr.f32.vlgmr.msra.gmra.mrb[4].mxu0 %v759_v54  ;;  %896 = vmatmul.mubr.f32.vlgmr.msra.gmra.mrb[4].mxu1 %v759_v54 }
 0x23a   :  { %2540 = vmatpush1.bf16.msra.mxu0 %v3309_v62  ;;  %2572 = vmatpush1.bf16.msra.mxu1 %v3318_v1 }
 0x23b   :  { %2542 = vmatprep.subr.bf16.mxu0 %v3327_v5  ;;  %2574 = vmatprep.subr.bf16.mxu1 %v3336_v8 }
 0x23c   :  { %994 = vmatprep.mubr.f32.mxu0 %v3098_v3  ;;  %1065 = vmatprep.mubr.f32.mxu1 %v3098_v3 }
 0x23e   :  { %2544 = vmatpush1.bf16.msra.mxu0 %v3349_v12  ;;  %2576 = vmatpush1.bf16.msra.mxu1 %v3359_v15 }
 0x23f   :  { %2546 = vmatprep.subr.bf16.mxu0 %v3369_v18  ;;  %2578 = vmatprep.subr.bf16.mxu1 %v3379_v21 }
 0x242   :  { %2548 = vmatpush1.bf16.msra.mxu0 %v3392_v25  ;;  %2580 = vmatpush1.bf16.msra.mxu1 %v3402_v28 }
 0x243   :  { %2550 = vmatprep.subr.bf16.mxu0 %v3412_v31  ;;  %2582 = vmatprep.subr.bf16.mxu1 %v3422_v34 }
 0x246   :  { %2552 = vmatpush1.bf16.msra.mxu0 %v3435_v38  ;;  %2584 = vmatpush1.bf16.msra.mxu1 %v3445_v41 }
 0x247   :  { %2554 = vmatprep.subr.bf16.mxu0 %v3455_v44  ;;  %2586 = vmatprep.subr.bf16.mxu1 %v3465_v47 }
 0x24a   :  { %2556 = vmatpush1.bf16.msra.mxu0 %v3478_v51  ;;  %2588 = vmatpush1.bf16.msra.mxu1 %v3488_v55 }
 0x24b   :  { %2558 = vmatprep.subr.bf16.mxu0 %v3498_v59  ;;  %2590 = vmatprep.subr.bf16.mxu1 %v3508_v63 }
 0x24e   :  { %2560 = vmatpush1.bf16.msra.mxu0 %v3521_v6  ;;  %2592 = vmatpush1.bf16.msra.mxu1 %v3531_v10 }
 0x24f   :  { %2562 = vmatprep.subr.bf16.mxu0 %v3541_v14  ;;  %2594 = vmatprep.subr.bf16.mxu1 %v3551_v19 }
 0x252   :  { %2564 = vmatpush1.bf16.msra.mxu0 %v3564_v24  ;;  %2596 = vmatpush1.bf16.msra.mxu1 %v3574_v29 }
 0x253   :  { %2566 = vmatprep.subr.bf16.mxu0 %v3584_v33  ;;  %2598 = vmatprep.subr.bf16.mxu1 %v3594_v37 }
 0x256   :  { %2568 = vmatpush1.bf16.msra.mxu0 %v3601_v40  ;;  %2600 = vmatpush1.bf16.msra.mxu1 %v3605_v42 }
 0x257   :  { %2602 = vmatprep.subr.bf16.mxu0 %v3284_v53  ;;  %2634 = vmatprep.subr.bf16.mxu1 %v3292_v56 }
 0x30c   :  { %v826_v46 = vpop.f32.mrb[4].mxu0  ;;  %v897_v57 = vpop.f32.mrb[4].mxu1 }
 0x30d   :  { %v2891_v58 = vadd.f32 %v826_v46, %v3657_v50  ;;  %v828_v60 = vpop.f32.mrb[5].mxu0  ;;  %v899_v61 = vpop.f32.mrb[5].mxu1  ;;  %v2907_v9 = vadd.f32 %v897_v57, %v3663_v7 }
 0x30e   :  { %v2892_v0 = vadd.f32 %v828_v60, %v3659_v52  ;;  %v2908_v11 = vadd.f32 %v899_v61, %v3666_v16 }
 0x30f   :  { %v2203_v2 = vmul.f32 -1.442695, %v2891_v58  ;;  %v2205_v13 = vmul.f32 -1.442695, %v2907_v9 }
 0x310   :  { %v2204_v4 = vmul.f32 -1.442695, %v2892_v0 }
 0x311   :  { %2990 = vpow2.f32 %v2203_v2 }
 0x312   :  { %2992 = vpow2.f32 %v2204_v4 }
 0x313   :  { %2994 = vtanh.f32 %v2908_v11 }
 0x314   :  { %2996 = vpow2.f32 %v2205_v13 }
 0x31b   :  { %v2991_v17 = vpop.eup %2990 }
 0x31c   :  { %v915_v20 = vadd.f32 1.0, %v2991_v17  ;;  %v2993_v22 = vpop.eup %2992 }
 0x31d   :  { %v916_v23 = vadd.f32 1.0, %v2993_v22  ;;  %v2995_v26 = vpop.eup %2994 }
 0x31e   :  { %2998 = vrcp.f32 %v915_v20  ;;  %v2997_v27 = vpop.eup %2996 }
 0x31f   :  { %3000 = vrcp.f32 %v916_v23  ;;  %v917_v36 = vadd.f32 1.0, %v2997_v27 }
 0x321   :  { %3002 = vrcp.f32 %v917_v36 }
 0x328   :  { %v2999_v30 = vpop.eup %2998 }
 0x329   :  { %v926_v32 = vmul.f32 %v2999_v30, %v2995_v26  ;;  %v3001_v35 = vpop.eup %3000 }
 0x32a   :  { %v925_v39 = vmul.f32 %v3001_v35, %v3711_v45 }
 0x32b   :  { %v3003_v48 = vpop.eup %3002 }
 0x32c   :  { %v3753_v43 = vadd.f32 %v926_v32, %v925_v39 }
 0x32e   :  { %3004 = vtanh.f32 %v3753_v43 }
 0x338   :  { %v3005_v49 = vpop.eup %3004 }
 0x339   :  { %v929_v54 = vmul.f32 %v3005_v49, %v3003_v48 }
 0x33b   :  { %995 = vmatmul.mubr.f32.vlgmr.msra.gmra.mrb[6].mxu0 %v929_v54  ;;  %1066 = vmatmul.mubr.f32.vlgmr.msra.gmra.mrb[6].mxu1 %v929_v54 }
 0x33c   :  { %2604 = vmatpush1.bf16.msra.mxu0 %v3309_v62  ;;  %2636 = vmatpush1.bf16.msra.mxu1 %v3318_v1 }
 0x33d   :  { %2606 = vmatprep.subr.bf16.mxu0 %v3327_v5  ;;  %2638 = vmatprep.subr.bf16.mxu1 %v3336_v8 }
 0x33e   :  { %1164 = vmatprep.mubr.f32.mxu0 %v3098_v3  ;;  %1235 = vmatprep.mubr.f32.mxu1 %v3098_v3 }
 0x340   :  { %2608 = vmatpush1.bf16.msra.mxu0 %v3349_v12  ;;  %2640 = vmatpush1.bf16.msra.mxu1 %v3359_v15 }
 0x341   :  { %2610 = vmatprep.subr.bf16.mxu0 %v3369_v18  ;;  %2642 = vmatprep.subr.bf16.mxu1 %v3379_v21 }
 0x344   :  { %2612 = vmatpush1.bf16.msra.mxu0 %v3392_v25  ;;  %2644 = vmatpush1.bf16.msra.mxu1 %v3402_v28 }
 0x345   :  { %2614 = vmatprep.subr.bf16.mxu0 %v3412_v31  ;;  %2646 = vmatprep.subr.bf16.mxu1 %v3422_v34 }
 0x348   :  { %2616 = vmatpush1.bf16.msra.mxu0 %v3435_v38  ;;  %2648 = vmatpush1.bf16.msra.mxu1 %v3445_v41 }
 0x349   :  { %2618 = vmatprep.subr.bf16.mxu0 %v3455_v44  ;;  %2650 = vmatprep.subr.bf16.mxu1 %v3465_v47 }
 0x34c   :  { %2620 = vmatpush1.bf16.msra.mxu0 %v3478_v51  ;;  %2652 = vmatpush1.bf16.msra.mxu1 %v3488_v55 }
 0x34d   :  { %2622 = vmatprep.subr.bf16.mxu0 %v3498_v59  ;;  %2654 = vmatprep.subr.bf16.mxu1 %v3508_v63 }
 0x350   :  { %2624 = vmatpush1.bf16.msra.mxu0 %v3521_v6  ;;  %2656 = vmatpush1.bf16.msra.mxu1 %v3531_v10 }
 0x351   :  { %2626 = vmatprep.subr.bf16.mxu0 %v3541_v14  ;;  %2658 = vmatprep.subr.bf16.mxu1 %v3551_v19 }
 0x354   :  { %2628 = vmatpush1.bf16.msra.mxu0 %v3564_v24  ;;  %2660 = vmatpush1.bf16.msra.mxu1 %v3574_v29 }
 0x355   :  { %2630 = vmatprep.subr.bf16.mxu0 %v3584_v33  ;;  %2662 = vmatprep.subr.bf16.mxu1 %v3594_v37 }
 0x358   :  { %2632 = vmatpush1.bf16.msra.mxu0 %v3601_v40  ;;  %2664 = vmatpush1.bf16.msra.mxu1 %v3605_v42 }
 0x359   :  { %2666 = vmatprep.subr.bf16.mxu0 %v3284_v53  ;;  %2698 = vmatprep.subr.bf16.mxu1 %v3292_v56 }
 0x40e   :  { %v996_v45 = vpop.f32.mrb[6].mxu0  ;;  %v1067_v46 = vpop.f32.mrb[6].mxu1 }
 0x40f   :  { %v2893_v57 = vadd.f32 %v996_v45, %v3657_v50  ;;  %v998_v58 = vpop.f32.mrb[7].mxu0  ;;  %v1069_v60 = vpop.f32.mrb[7].mxu1  ;;  %v2909_v4 = vadd.f32 %v1067_v46, %v3663_v7 }
 0x410   :  { %v2894_v61 = vadd.f32 %v998_v58, %v3659_v52  ;;  %v2910_v9 = vadd.f32 %v1069_v60, %v3666_v16 }
 0x411   :  { %v2206_v0 = vmul.f32 -1.442695, %v2893_v57  ;;  %v2208_v11 = vmul.f32 -1.442695, %v2909_v4 }
 0x412   :  { %v2207_v2 = vmul.f32 -1.442695, %v2894_v61 }
 0x413   :  { %3006 = vpow2.f32 %v2206_v0 }
 0x414   :  { %3008 = vpow2.f32 %v2207_v2 }
 0x415   :  { %3010 = vtanh.f32 %v2910_v9 }
 0x416   :  { %3012 = vpow2.f32 %v2208_v11 }
 0x41d   :  { %v3007_v13 = vpop.eup %3006 }
 0x41e   :  { %v1085_v17 = vadd.f32 1.0, %v3007_v13  ;;  %v3009_v20 = vpop.eup %3008 }
 0x41f   :  { %v1086_v22 = vadd.f32 1.0, %v3009_v20  ;;  %v3011_v23 = vpop.eup %3010 }
 0x420   :  { %3014 = vrcp.f32 %v1085_v17  ;;  %v3013_v26 = vpop.eup %3012 }
 0x421   :  { %3016 = vrcp.f32 %v1086_v22  ;;  %v1087_v35 = vadd.f32 1.0, %v3013_v26 }
 0x423   :  { %3018 = vrcp.f32 %v1087_v35 }
 0x42a   :  { %v3015_v27 = vpop.eup %3014 }
 0x42b   :  { %v1096_v30 = vmul.f32 %v3015_v27, %v3011_v23  ;;  %v3017_v32 = vpop.eup %3016 }
 0x42c   :  { %v1095_v36 = vmul.f32 %v3017_v32, %v3753_v43 }
 0x42d   :  { %v3019_v48 = vpop.eup %3018 }
 0x42e   :  { %v3795_v39 = vadd.f32 %v1096_v30, %v1095_v36 }
 0x430   :  { %3020 = vtanh.f32 %v3795_v39 }
 0x43a   :  { %v3021_v49 = vpop.eup %3020 }
 0x43b   :  { %v1099_v54 = vmul.f32 %v3021_v49, %v3019_v48 }
 0x43d   :  { %1165 = vmatmul.mubr.f32.vlgmr.msra.gmra.mrb[8].mxu0 %v1099_v54  ;;  %1236 = vmatmul.mubr.f32.vlgmr.msra.gmra.mrb[8].mxu1 %v1099_v54 }
 0x43e   :  { %2668 = vmatpush1.bf16.msra.mxu0 %v3309_v62  ;;  %2700 = vmatpush1.bf16.msra.mxu1 %v3318_v1 }
 0x43f   :  { %2670 = vmatprep.subr.bf16.mxu0 %v3327_v5  ;;  %2702 = vmatprep.subr.bf16.mxu1 %v3336_v8 }
 0x440   :  { %1334 = vmatprep.mubr.f32.mxu0 %v3098_v3  ;;  %1405 = vmatprep.mubr.f32.mxu1 %v3098_v3 }
 0x442   :  { %2672 = vmatpush1.bf16.msra.mxu0 %v3349_v12  ;;  %2704 = vmatpush1.bf16.msra.mxu1 %v3359_v15 }
 0x443   :  { %2674 = vmatprep.subr.bf16.mxu0 %v3369_v18  ;;  %2706 = vmatprep.subr.bf16.mxu1 %v3379_v21 }
 0x446   :  { %2676 = vmatpush1.bf16.msra.mxu0 %v3392_v25  ;;  %2708 = vmatpush1.bf16.msra.mxu1 %v3402_v28 }
 0x447   :  { %2678 = vmatprep.subr.bf16.mxu0 %v3412_v31  ;;  %2710 = vmatprep.subr.bf16.mxu1 %v3422_v34 }
 0x44a   :  { %2680 = vmatpush1.bf16.msra.mxu0 %v3435_v38  ;;  %2712 = vmatpush1.bf16.msra.mxu1 %v3445_v41 }
 0x44b   :  { %2682 = vmatprep.subr.bf16.mxu0 %v3455_v44  ;;  %2714 = vmatprep.subr.bf16.mxu1 %v3465_v47 }
 0x44e   :  { %2684 = vmatpush1.bf16.msra.mxu0 %v3478_v51  ;;  %2716 = vmatpush1.bf16.msra.mxu1 %v3488_v55 }
 0x44f   :  { %2686 = vmatprep.subr.bf16.mxu0 %v3498_v59  ;;  %2718 = vmatprep.subr.bf16.mxu1 %v3508_v63 }
 0x452   :  { %2688 = vmatpush1.bf16.msra.mxu0 %v3521_v6  ;;  %2720 = vmatpush1.bf16.msra.mxu1 %v3531_v10 }
 0x453   :  { %2690 = vmatprep.subr.bf16.mxu0 %v3541_v14  ;;  %2722 = vmatprep.subr.bf16.mxu1 %v3551_v19 }
 0x456   :  { %2692 = vmatpush1.bf16.msra.mxu0 %v3564_v24  ;;  %2724 = vmatpush1.bf16.msra.mxu1 %v3574_v29 }
 0x457   :  { %2694 = vmatprep.subr.bf16.mxu0 %v3584_v33  ;;  %2726 = vmatprep.subr.bf16.mxu1 %v3594_v37 }
 0x45a   :  { %2696 = vmatpush1.bf16.msra.mxu0 %v3601_v40  ;;  %2728 = vmatpush1.bf16.msra.mxu1 %v3605_v42 }
 0x45b   :  { %2730 = vmatprep.subr.bf16.mxu0 %v3284_v53  ;;  %2762 = vmatprep.subr.bf16.mxu1 %v3292_v56 }
 0x510   :  { %v1166_v43 = vpop.f32.mrb[8].mxu0  ;;  %v1237_v45 = vpop.f32.mrb[8].mxu1 }
 0x511   :  { %v2895_v46 = vadd.f32 %v1166_v43, %v3657_v50  ;;  %v1168_v57 = vpop.f32.mrb[9].mxu0  ;;  %v1239_v58 = vpop.f32.mrb[9].mxu1  ;;  %v2911_v2 = vadd.f32 %v1237_v45, %v3663_v7 }
 0x512   :  { %v2896_v60 = vadd.f32 %v1168_v57, %v3659_v52  ;;  %v2912_v4 = vadd.f32 %v1239_v58, %v3666_v16 }
 0x513   :  { %v2209_v61 = vmul.f32 -1.442695, %v2895_v46  ;;  %v2211_v9 = vmul.f32 -1.442695, %v2911_v2 }
 0x514   :  { %v2210_v0 = vmul.f32 -1.442695, %v2896_v60 }
 0x515   :  { %3022 = vpow2.f32 %v2209_v61 }
 0x516   :  { %3024 = vpow2.f32 %v2210_v0 }
 0x517   :  { %3026 = vtanh.f32 %v2912_v4 }
 0x518   :  { %3028 = vpow2.f32 %v2211_v9 }
 0x51f   :  { %v3023_v11 = vpop.eup %3022 }
 0x520   :  { %v1255_v13 = vadd.f32 1.0, %v3023_v11  ;;  %v3025_v17 = vpop.eup %3024 }
 0x521   :  { %v1256_v20 = vadd.f32 1.0, %v3025_v17  ;;  %v3027_v22 = vpop.eup %3026 }
 0x522   :  { %3030 = vrcp.f32 %v1255_v13  ;;  %v3029_v23 = vpop.eup %3028 }
 0x523   :  { %3032 = vrcp.f32 %v1256_v20  ;;  %v1257_v32 = vadd.f32 1.0, %v3029_v23 }
 0x525   :  { %3034 = vrcp.f32 %v1257_v32 }
 0x52c   :  { %v3031_v26 = vpop.eup %3030 }
 0x52d   :  { %v1266_v27 = vmul.f32 %v3031_v26, %v3027_v22  ;;  %v3033_v30 = vpop.eup %3032 }
 0x52e   :  { %v1265_v35 = vmul.f32 %v3033_v30, %v3795_v39 }
 0x52f   :  { %v3035_v48 = vpop.eup %3034 }
 0x530   :  { %v3837_v36 = vadd.f32 %v1266_v27, %v1265_v35 }
 0x532   :  { %3036 = vtanh.f32 %v3837_v36 }
 0x53c   :  { %v3037_v49 = vpop.eup %3036 }
 0x53d   :  { %v1269_v54 = vmul.f32 %v3037_v49, %v3035_v48  ;;  %v1783_v49 = vld [vmem:[%s4051_s4 + $0x18] sm:$0xff] }
 0x53f   :  { %1335 = vmatmul.mubr.f32.vlgmr.msra.gmra.mrb[10].mxu0 %v1269_v54  ;;  %1406 = vmatmul.mubr.f32.vlgmr.msra.gmra.mrb[10].mxu1 %v1269_v54 }
 0x540   :  { %2732 = vmatpush1.bf16.msra.mxu0 %v3309_v62  ;;  %2764 = vmatpush1.bf16.msra.mxu1 %v3318_v1 }
 0x541   :  { %2734 = vmatprep.subr.bf16.mxu0 %v3327_v5  ;;  %2766 = vmatprep.subr.bf16.mxu1 %v3336_v8 }
 0x542   :  { %1504 = vmatprep.mubr.f32.mxu0 %v3098_v3  ;;  %1575 = vmatprep.mubr.f32.mxu1 %v3098_v3 }
 0x544   :  { %2736 = vmatpush1.bf16.msra.mxu0 %v3349_v12  ;;  %2768 = vmatpush1.bf16.msra.mxu1 %v3359_v15 }
 0x545   :  { %2738 = vmatprep.subr.bf16.mxu0 %v3369_v18  ;;  %2770 = vmatprep.subr.bf16.mxu1 %v3379_v21 }
 0x548   :  { %2740 = vmatpush1.bf16.msra.mxu0 %v3392_v25  ;;  %2772 = vmatpush1.bf16.msra.mxu1 %v3402_v28 }
 0x549   :  { %2742 = vmatprep.subr.bf16.mxu0 %v3412_v31  ;;  %2774 = vmatprep.subr.bf16.mxu1 %v3422_v34 }
 0x54c   :  { %2744 = vmatpush1.bf16.msra.mxu0 %v3435_v38  ;;  %2776 = vmatpush1.bf16.msra.mxu1 %v3445_v41 }
 0x54d   :  { %2746 = vmatprep.subr.bf16.mxu0 %v3455_v44  ;;  %2778 = vmatprep.subr.bf16.mxu1 %v3465_v47 }
 0x550   :  { %2748 = vmatpush1.bf16.msra.mxu0 %v3478_v51  ;;  %2780 = vmatpush1.bf16.msra.mxu1 %v3488_v55 }
 0x551   :  { %2750 = vmatprep.subr.bf16.mxu0 %v3498_v59  ;;  %2782 = vmatprep.subr.bf16.mxu1 %v3508_v63 }
 0x554   :  { %2752 = vmatpush1.bf16.msra.mxu0 %v3521_v6  ;;  %2784 = vmatpush1.bf16.msra.mxu1 %v3531_v10 }
 0x555   :  { %2754 = vmatprep.subr.bf16.mxu0 %v3541_v14  ;;  %2786 = vmatprep.subr.bf16.mxu1 %v3551_v19 }
 0x558   :  { %2756 = vmatpush1.bf16.msra.mxu0 %v3564_v24  ;;  %2788 = vmatpush1.bf16.msra.mxu1 %v3574_v29 }
 0x559   :  { %2758 = vmatprep.subr.bf16.mxu0 %v3584_v33  ;;  %2790 = vmatprep.subr.bf16.mxu1 %v3594_v37 }
 0x55c   :  { %2760 = vmatpush1.bf16.msra.mxu0 %v3601_v40  ;;  %2792 = vmatpush1.bf16.msra.mxu1 %v3605_v42 }
 0x55d   :  { %2794 = vmatprep.subr.bf16.mxu0 %v3284_v53  ;;  %2826 = vmatprep.subr.bf16.mxu1 %v3292_v56 }
 0x612   :  { %v1336_v39 = vpop.f32.mrb[10].mxu0  ;;  %v1407_v43 = vpop.f32.mrb[10].mxu1 }
 0x613   :  { %v2897_v45 = vadd.f32 %v1336_v39, %v3657_v50  ;;  %v1338_v46 = vpop.f32.mrb[11].mxu0  ;;  %v1409_v57 = vpop.f32.mrb[11].mxu1  ;;  %v2913_v0 = vadd.f32 %v1407_v43, %v3663_v7  ;;  %v1784_v39 = vld [vmem:[%s4051_s4 + $0x20] sm:$0xff]  ;;  %v1785_v43 = vld [vmem:[%s4051_s4 + $0x28] sm:$0xff] }
 0x614   :  { %v2898_v58 = vadd.f32 %v1338_v46, %v3659_v52  ;;  %v2914_v2 = vadd.f32 %v1409_v57, %v3666_v16  ;;  %v1786_v46 = vld [vmem:[%s4051_s4 + $0x30] sm:$0xff]  ;;  %v1787_v57 = vld [vmem:[%s4051_s4 + $0x38] sm:$0xff] }
 0x615   :  { %v2212_v60 = vmul.f32 -1.442695, %v2897_v45  ;;  %v2214_v4 = vmul.f32 -1.442695, %v2913_v0  ;;  %v2864_v45 = vpack.c.bf16 %v1785_v43, %v1784_v39 }
 0x616   :  { %v2213_v61 = vmul.f32 -1.442695, %v2898_v58  ;;  %v2867_v58 = vpack.c.bf16 %v1787_v57, %v1786_v46  ;;  %v2229_v57 = vld [vmem:[%s4058_s10] ss:$0 sm:$0xff] }
 0x617   :  { %3038 = vpow2.f32 %v2212_v60  ;;  %v1960_v60 = vld [vmem:[%s4052_s8] sm:$0xff] }
 0x618   :  { %3040 = vpow2.f32 %v2213_v61  ;;  %v1961_v61 = vld [vmem:[%s4052_s8 + $0x8] sm:$0xff] }
 0x619   :  { %3042 = vtanh.f32 %v2914_v2  ;;  %v2885_v0 = vpack.c.bf16 %v1961_v61, %v1960_v60  ;;  %v1962_v2 = vld [vmem:[%s4052_s8 + $0x10] sm:$0xf] }
 0x61a   :  { %3044 = vpow2.f32 %v2214_v4  ;;  %v1869_v4 = vld [vmem:[%s4053_s6] sm:$0xff] }
 0x621   :  { %v3039_v53 = vpop.eup %3038 }
 0x622   :  { %v1425_v9 = vadd.f32 1.0, %v3039_v53  ;;  %v3041_v56 = vpop.eup %3040  ;;  %v1870_v53 = vld [vmem:[%s4053_s6 + $0x8] sm:$0xff] }
 0x623   :  { %v1426_v11 = vadd.f32 1.0, %v3041_v56  ;;  %v3043_v13 = vpop.eup %3042  ;;  %v2870_v56 = vpack.c.bf16 %v1870_v53, %v1869_v4 }
 0x624   :  { %3046 = vrcp.f32 %v1425_v9  ;;  %v3045_v17 = vpop.eup %3044  ;;  %v1871_v9 = vld [vmem:[%s4053_s6 + $0x10] sm:$0xff] }
 0x625   :  { %3048 = vrcp.f32 %v1426_v11  ;;  %v1427_v26 = vadd.f32 1.0, %v3045_v17  ;;  %v1872_v11 = vld [vmem:[%s4053_s6 + $0x18] sm:$0xff]  ;;  %v1873_v17 = vld [vmem:[%s4053_s6 + $0x20] sm:$0xff] }
 0x627   :  { %3050 = vrcp.f32 %v1427_v26  ;;  %v1876_v26 = vld [vmem:[%s4053_s6 + $0x38] sm:$0xff] }
 0x62e   :  { %v3047_v20 = vpop.eup %3046 }
 0x62f   :  { %v1436_v22 = vmul.f32 %v3047_v20, %v3043_v13  ;;  %v3049_v23 = vpop.eup %3048  ;;  %v2873_v13 = vpack.c.bf16 %v1872_v11, %v1871_v9  ;;  %v1874_v20 = vld [vmem:[%s4053_s6 + $0x28] sm:$0xff] }
 0x630   :  { %v1435_v27 = vmul.f32 %v3049_v23, %v3837_v36  ;;  %v1782_v36 = vld [vmem:[%s4051_s4 + $0x10] sm:$0xff] }
 0x631   :  { %v3051_v32 = vpop.eup %3050  ;;  %v2861_v54 = vpack.c.bf16 %v1783_v49, %v1782_v36  ;;  %v1875_v23 = vld [vmem:[%s4053_s6 + $0x30] sm:$0xff]  ;;  %v2230_v36 = vld [vmem:[%s4056_s11] ss:$0 sm:$0xff] }
 0x632   :  { %v3879_v30 = vadd.f32 %v1436_v22, %v1435_v27  ;;  %v2876_v22 = vpack.c.bf16 %v1874_v20, %v1873_v17  ;;  %v2879_v27 = vpack.c.bf16 %v1876_v26, %v1875_v23  ;;  %v2223_v49 = vld [vmem:[%s4057_s7] ss:$0 sm:$0xff]  ;;  %s3103_s7 = smov 123  }
 0x634   :  { %3052 = vtanh.f32 %v3879_v30 }
 0x63e   :  { %v3053_v35 = vpop.eup %3052 }
 0x63f   :  { %v3882_v48 = vmul.f32 %v3053_v35, %v3051_v32 }
 0x641   :  { %1505 = vmatmul.mubr.f32.vlgmr.msra.gmra.mrb[12].mxu0 %v3882_v48  ;;  %1576 = vmatmul.mubr.f32.vlgmr.msra.gmra.mrb[12].mxu1 %v3882_v48 }
 0x642   :  { %2796 = vmatpush1.bf16.msra.mxu0 %v3309_v62  ;;  %2828 = vmatpush1.bf16.msra.mxu1 %v3318_v1  ;;  %v3099_v62 = vmov 0.0|0.0  }
 0x643   :  { %2798 = vmatprep.subr.bf16.mxu0 %v3327_v5  ;;  %2830 = vmatprep.subr.bf16.mxu1 %v3336_v8 }
 0x644   :  { %1674 = vmatprep.mubr.f32.mxu0 %v3098_v3  ;;  %1745 = vmatprep.mubr.f32.mxu1 %v3098_v3 }
 0x646   :  { %2800 = vmatpush1.bf16.msra.mxu0 %v3349_v12  ;;  %2832 = vmatpush1.bf16.msra.mxu1 %v3359_v15 }
 0x647   :  { %2802 = vmatprep.subr.bf16.mxu0 %v3369_v18  ;;  %2834 = vmatprep.subr.bf16.mxu1 %v3379_v21 }
 0x64a   :  { %2804 = vmatpush1.bf16.msra.mxu0 %v3392_v25  ;;  %2836 = vmatpush1.bf16.msra.mxu1 %v3402_v28 }
 0x64b   :  { %2806 = vmatprep.subr.bf16.mxu0 %v3412_v31  ;;  %2838 = vmatprep.subr.bf16.mxu1 %v3422_v34 }
 0x64e   :  { %2808 = vmatpush1.bf16.msra.mxu0 %v3435_v38  ;;  %2840 = vmatpush1.bf16.msra.mxu1 %v3445_v41 }
 0x64f   :  { %2810 = vmatprep.subr.bf16.mxu0 %v3455_v44  ;;  %2842 = vmatprep.subr.bf16.mxu1 %v3465_v47 }
 0x652   :  { %2812 = vmatpush1.bf16.msra.mxu0 %v3478_v51  ;;  %2844 = vmatpush1.bf16.msra.mxu1 %v3488_v55 }
 0x653   :  { %2814 = vmatprep.subr.bf16.mxu0 %v3498_v59  ;;  %2846 = vmatprep.subr.bf16.mxu1 %v3508_v63 }
 0x656   :  { %2816 = vmatpush1.bf16.msra.mxu0 %v3521_v6  ;;  %2848 = vmatpush1.bf16.msra.mxu1 %v3531_v10 }
 0x657   :  { %2818 = vmatprep.subr.bf16.mxu0 %v3541_v14  ;;  %2850 = vmatprep.subr.bf16.mxu1 %v3551_v19 }
 0x65a   :  { %2820 = vmatpush1.bf16.msra.mxu0 %v3564_v24  ;;  %2852 = vmatpush1.bf16.msra.mxu1 %v3574_v29  ;;  %v1780_v24 = vld [vmem:[%s4051_s4] sm:$0xff]  ;;  %v1781_v29 = vld [vmem:[%s4051_s4 + $0x8] sm:$0xff] }
 0x65b   :  { %2822 = vmatprep.subr.bf16.mxu0 %v3584_v33  ;;  %2854 = vmatprep.subr.bf16.mxu1 %v3594_v37 }
 0x65e   :  { %2824 = vmatpush1.bf16.msra.mxu0 %v3601_v40  ;;  %2856 = vmatpush1.bf16.msra.mxu1 %v3605_v42  ;;  %v2858_v40 = vpack.c.bf16 %v1781_v29, %v1780_v24 }
 0x65f   :  { %2857 = vmatprep.subr.bf16.mxu0 %v3099_v62  ;;  %2869 = vmatprep.subr.bf16.mxu1 %v3099_v62 }
 0x714   :  { %v1506_v1 = vpop.f32.mrb[12].mxu0  ;;  %v1577_v5 = vpop.f32.mrb[12].mxu1 }
 0x715   :  { %v2899_v8 = vadd.f32 %v1506_v1, %v3657_v50  ;;  %v1508_v12 = vpop.f32.mrb[13].mxu0  ;;  %v1579_v15 = vpop.f32.mrb[13].mxu1  ;;  %v2915_v28 = vadd.f32 %v1577_v5, %v3663_v7 }
 0x716   :  { %v2900_v18 = vadd.f32 %v1508_v12, %v3659_v52  ;;  %v2916_v31 = vadd.f32 %v1579_v15, %v3666_v16 }
 0x717   :  { %v2215_v21 = vmul.f32 -1.442695, %v2899_v8  ;;  %v2217_v34 = vmul.f32 -1.442695, %v2915_v28 }
 0x718   :  { %v2216_v25 = vmul.f32 -1.442695, %v2900_v18 }
 0x719   :  { %3054 = vpow2.f32 %v2215_v21 }
 0x71a   :  { %3056 = vpow2.f32 %v2216_v25 }
 0x71b   :  { %3058 = vtanh.f32 %v2916_v31 }
 0x71c   :  { %3060 = vpow2.f32 %v2217_v34 }
 0x723   :  { %v3055_v38 = vpop.eup %3054 }
 0x724   :  { %v1595_v41 = vadd.f32 1.0, %v3055_v38  ;;  %v3057_v44 = vpop.eup %3056 }
 0x725   :  { %v1596_v47 = vadd.f32 1.0, %v3057_v44  ;;  %v3059_v51 = vpop.eup %3058 }
 0x726   :  { %3062 = vrcp.f32 %v1595_v41  ;;  %v3061_v55 = vpop.eup %3060 }
 0x727   :  { %3064 = vrcp.f32 %v1596_v47  ;;  %v1597_v10 = vadd.f32 1.0, %v3061_v55 }
 0x729   :  { %3066 = vrcp.f32 %v1597_v10 }
 0x730   :  { %v3063_v59 = vpop.eup %3062 }
 0x731   :  { %v1606_v63 = vmul.f32 %v3063_v59, %v3059_v51  ;;  %v3065_v6 = vpop.eup %3064 }
 0x732   :  { %v1605_v14 = vmul.f32 %v3065_v6, %v3879_v30 }
 0x733   :  { %v3067_v33 = vpop.eup %3066 }
 0x734   :  { %v3925_v19 = vadd.f32 %v1606_v63, %v1605_v14 }
 0x736   :  { %3068 = vtanh.f32 %v3925_v19 }
 0x740   :  { %v3069_v37 = vpop.eup %3068 }
 0x741   :  { %v1609_v42 = vmul.f32 %v3069_v37, %v3067_v33  ;;  %v1964_v37 = vld [vmem:[%s4055_s9 + $0x8] sm:$0xff] }
 0x743   :  { %1675 = vmatmul.mubr.f32.vlgmr.msra.gmra.mrb[14].mxu0 %v1609_v42  ;;  %1746 = vmatmul.mubr.f32.vlgmr.msra.gmra.mrb[14].mxu1 %v1609_v42  ;;  %v1965_v42 = vld [vmem:[%s4055_s9 + $0x10] sm:$0xf] }
 0x744   :  { %2859 = vmatpush3.bf16.msra.mxu0 %v2858_v40  ;;  %2273 = vmatprep.mubr.msk.f32.mxu0 %vm3100_vm1, %v3098_v3 }
 0x745   :  { %2860 = vmatprep.subr.bf16.mxu0 %v3099_v62  ;;  %2292 = vmatprep.mubr.msk.f32.mxu1 %vm3100_vm1, %v3098_v3 }
 0x746   :  { %2871 = vmatpush3.bf16.msra.mxu1 %v2870_v56 }
 0x747   :  { %2872 = vmatprep.subr.bf16.mxu1 %v3099_v62 }
 0x748   :  { %2862 = vmatpush3.bf16.msra.mxu0 %v2861_v54 }
 0x749   :  { %2863 = vmatprep.subr.bf16.mxu0 %v3099_v62 }
 0x74a   :  { %2874 = vmatpush3.bf16.msra.mxu1 %v2873_v13 }
 0x74b   :  { %2875 = vmatprep.subr.bf16.mxu1 %v3099_v62 }
 0x74c   :  { %2865 = vmatpush3.bf16.msra.mxu0 %v2864_v45 }
 0x74d   :  { %2866 = vmatprep.subr.bf16.mxu0 %v3099_v62 }
 0x74e   :  { %2877 = vmatpush3.bf16.msra.mxu1 %v2876_v22 }
 0x74f   :  { %2878 = vmatprep.subr.bf16.mxu1 %v3099_v62 }
 0x750   :  { %2868 = vmatpush3.bf16.msra.mxu0 %v2867_v58 }
 0x751   :  { %2884 = vmatprep.subr.bf16.mxu0 %v3099_v62 }
 0x752   :  { %2880 = vmatpush3.bf16.msra.mxu1 %v2879_v27 }
 0x753   :  { %2274 = vmatmul.mubr.msk.f32.vlgmr.msra.gmra.mrb[16].mxu0 %vm105_vm0, %v3882_v48  ;;  %2881 = vmatprep.subr.bf16.mxu1 %v3099_v62  ;;  %v2221_v62 = vld [vmem:[%s4054_s5] ss:$0 sm:$0xff]  ;;  %s3101_s5 = smov 64  }
 0x754   :  { %2310 = vmatprep.mubr.msk.f32.mxu0 %vm3100_vm1, %v3098_v3  ;;  %2886 = vmatpush3.bf16.msra.mxu0 %v2885_v0 }
 0x755   :  { %2308 = vmatprep.subr.mxu0 %v3098_v3 }
 0x758   :  { %2309 = vmatpush3.msk.msra.mxu0 %vm1970_vm2, %v1962_v2 }
 0x816   :  { %v1676_v30 = vpop.f32.mrb[14].mxu0  ;;  %v1747_v32 = vpop.f32.mrb[14].mxu1 }
 0x817   :  { %v2901_v35 = vadd.f32 %v1676_v30, %v3657_v50  ;;  %v1678_v48 = vpop.f32.mrb[15].mxu0  ;;  %v1749_v1 = vpop.f32.mrb[15].mxu1  ;;  %v2917_v15 = vadd.f32 %v1747_v32, %v3663_v7 }
 0x818   :  { %v2902_v5 = vadd.f32 %v1678_v48, %v3659_v52  ;;  %v2918_v18 = vadd.f32 %v1749_v1, %v3666_v16 }
 0x819   :  { %v2218_v8 = vmul.f32 -1.442695, %v2901_v35  ;;  %v2220_v21 = vmul.f32 -1.442695, %v2917_v15 }
 0x81a   :  { %v2219_v12 = vmul.f32 -1.442695, %v2902_v5 }
 0x81b   :  { %3070 = vpow2.f32 %v2218_v8 }
 0x81c   :  { %3072 = vpow2.f32 %v2219_v12 }
 0x81d   :  { %3074 = vtanh.f32 %v2918_v18 }
 0x81e   :  { %3076 = vpow2.f32 %v2220_v21 }
 0x825   :  { %v3071_v25 = vpop.eup %3070 }
 0x826   :  { %v1765_v28 = vadd.f32 1.0, %v3071_v25  ;;  %v1864_v50 = vpop.f32.mrb[16].mxu0  ;;  %v3073_v31 = vpop.eup %3072 }
 0x827   :  { %v1865_v52 = vadd.f32 %v2221_v62, %v1864_v50  ;;  %v2275_v34 = vpop.f32.mrb[17].mxu0  ;;  %v1766_v38 = vadd.f32 1.0, %v3073_v31  ;;  %v3075_v7 = vpop.eup %3074 }
 0x828   :  { %3078 = vrcp.f32 %v1765_v28  ;;  %v3077_v41 = vpop.eup %3076 }
 0x829   :  { %3080 = vrcp.f32 %v1766_v38  ;;  %v1767_v51 = vadd.f32 1.0, %v3077_v41 }
 0x82a   :  { %3082 = vtanh.f32 %v1865_v52 }
 0x82b   :  { %3084 = vrcp.f32 %v1767_v51 }
 0x832   :  { %v3079_v16 = vpop.eup %3078 }
 0x833   :  { %v1776_v44 = vmul.f32 %v3079_v16, %v3075_v7  ;;  %v3081_v47 = vpop.eup %3080 }
 0x834   :  { %v3083_v55 = vpop.eup %3082  ;;  %v1775_v59 = vmul.f32 %v3081_v47, %v3925_v19  ;;  %v1963_v19 = vld [vmem:[%s4055_s9] sm:$0xff] }
 0x835   :  { %2311 = vmatmul.mubr.msk.f32.vlgmr.msra.gmra.mrb[18].mxu0 %vm1966_vm3, %v3083_v55  ;;  %v3085_v6 = vpop.eup %3084  ;;  %v2882_v40 = vpack.c.bf16 %v1964_v37, %v1963_v19 }
 0x836   :  { %v1777_v63 = vadd.f32 %v1776_v44, %v1775_v59 }
 0x838   :  { %3086 = vtanh.f32 %v1777_v63 }
 0x842   :  { %v3087_v10 = vpop.eup %3086 }
 0x843   :  { %v1779_v14 = vmul.f32 %v3087_v10, %v3085_v6 }
 0x845   :  { %1885 = vrot.lane.b32.xlu0 %v1779_v14, %s3101_s5 }
 0x849   :  { %2147 = vrot.lane.b32.xlu0 %v2230_v36, %s3102_s22 }
 0x8b7   :  { %v1886_v24 = vpop.permute.xlu0 %1885 }
 0x8b8   :  { %2293 = vmatmul.mubr.msk.f32.vlgmr.msra.gmra.mrb[16].mxu1 %vm105_vm0, %v1886_v24 }
 0x8b9   :  { %2301 = vmatprep.mubr.msk.f32.mxu1 %vm3100_vm1, %v3098_v3  ;;  %2883 = vmatpush3.bf16.msra.mxu1 %v2882_v40 }
 0x8ba   :  { %2299 = vmatprep.subr.mxu1 %v3098_v3 }
 0x8bb   :  { %v2148_v46 = vpop.permute.xlu0 %2147 }
 0x8bd   :  { %2300 = vmatpush3.msk.msra.mxu1 %vm1970_vm2, %v1965_v42 }
 0x908   :  { %v2116_v29 = vpop.f32.mrb[18].mxu0 }
 0x909   :  { %v2312_v33 = vpop.f32.mrb[19].mxu0 }
 0x98b   :  { %v1955_v54 = vpop.f32.mrb[16].mxu1 }
 0x98c   :  { %v1956_v39 = vadd.f32 %v2223_v49, %v1955_v54  ;;  %v2294_v43 = vpop.f32.mrb[17].mxu1 }
 0x98e   :  { %3088 = vtanh.f32 %v1956_v39 }
 0x998   :  { %v3089_v3 = vpop.eup %3088 }
 0x999   :  { %2302 = vmatmul.mubr.msk.f32.vlgmr.msra.gmra.mrb[18].mxu1 %vm1966_vm3, %v3089_v3 }
 0xa6c   :  { %v2040_v45 = vpop.f32.mrb[18].mxu1 }
 0xa6d   :  { %v2117_v58 = vadd.f32 %v2116_v29, %v2040_v45  ;;  %v2303_v60 = vpop.f32.mrb[19].mxu1 }
 0xa6f   :  { %v2150_v61 = vadd.f32 %v2148_v46, %v2117_v58  ;;  %v2127_v0 = vadd.f32 %v2229_v57, %v2117_v58 }
 0xa71   :  { %v2129_v2 = vsel %vm2128_vm4, %v2127_v0, -inf  ;;  %v2152_v4 = vsel %vm2151_vm5, %v2150_v61, -inf }
 0xa72   :  { %2130 = vmax.xlane.f32.xlu0 %v2129_v2  ;;  %2153 = vmax.xlane.f32.xlu1 %v2152_v4 }
 0xaff   :  { %v2154_v53 = vpop.xlane.xlu1 %2153  ;;  %v2131_v9 = vpop.xlane.xlu0 %2130 }
 0xb00   :  { %v2155_v56 = vsub.f32 %v2150_v61, %v2154_v53  ;;  %v2132_v11 = vsub.f32 %v2127_v0, %v2131_v9 }
 0xb02   :  { %v2156_v13 = vmul.f32 1.442695, %v2155_v56  ;;  %v2133_v17 = vmul.f32 1.442695, %v2132_v11 }
 0xb04   :  { %3090 = vpow2.f32 %v2156_v13 }
 0xb05   :  { %3092 = vpow2.f32 %v2133_v17 }
 0xb0e   :  { %v3091_v20 = vpop.eup %3090 }
 0xb0f   :  { %v3093_v22 = vpop.eup %3092  ;;  %2159 = vrot.lane.b32.xlu1 %v3091_v20, %s3103_s7 }
 0xb10   :  { %v2135_v23 = vsel %vm2128_vm4, %v3093_v22, 0.0 }
 0xb11   :  { %2136 = vadd.xlane.f32.xlu0 %v2135_v23 }
 0xb81   :  { %v2160_v26 = vpop.permute.xlu1 %2159 }
 0xb82   :  { %v2163_v27 = vsel %vm2162_vm6, %v2160_v26, 0.0 }
 0xb83   :  { %2164 = vadd.xlane.f32.xlu1 %v2163_v27 }
 0xb9e   :  { %v2137_v30 = vpop.xlane.xlu0 %2136 }
 0xb9f   :  { %3094 = vrcp.f32 %v2137_v30 }
 0xba9   :  { %v3095_v32 = vpop.eup %3094 }
 0xbaa   :  { %v2139_v35 = vmul.f32 %v3095_v32, %v3093_v22 }
 0xbac   :  { %2140 = vst.msk [vmem:[%s4059_s12] sm:$0xff] %vm2128_vm4, %v2139_v35 }
 0xc10   :  { %v2165_v48 = vpop.xlane.xlu1 %2164 }
 0xc11   :  { %3096 = vrcp.f32 %v2165_v48 }
 0xc1b   :  { %v3097_v1 = vpop.eup %3096 }
 0xc1c   :  { %v2167_v5 = vmul.f32 %v3097_v1, %v3091_v20 }
 0xc1e   :  { %2169 = vrot.lane.b32.xlu0 %v2167_v5, %s3103_s7 }
 0xc90   :  { %v2170_v8 = vpop.permute.xlu0 %2169 }
 0xc91   :  { %2172 = vst.msk [vmem:[%s4060_s13] sm:$0xff] %vm2162_vm6, %v2170_v8 }

</bundles_post_ra>
